<compile_context>
chip_gen: v7x
topology: tpu7x:2x2x1
jax: 0.10.0
libtpu: 0.0.40
codegen_flags: <defaults>
</compile_context>

<pallas_src>
import functools

import jax
import jax.numpy as jnp
import numpy as np
from jax.experimental import pallas as pl
from jax.experimental.pallas import tpu as pltpu


def _round_up(x, m):
    return ((x + m - 1) // m) * m


def _tpu_kind():
    try:
        return jax.devices()[0].device_kind.lower()
    except Exception:
        return ""


def _pick_tb(N, L, Lp, H, C_in, two_cores, vmem_budget=8 << 20):
    """Pick the batch tile (multiple of 8 so the (tb, H) output block is aligned)."""
    # Rough per-batch-row VMEM footprint: double-buffered bf16 input block,
    # double-buffered f32 output block, bf16 padded-h1 scratch, f32 intermediates.
    per_row = (2 * Lp * C_in * 2) + (2 * H * 4) + (Lp * H * 2) + (5 * L * H * 4)
    tb_vmem = max(8, (vmem_budget // max(per_row, 1)) // 8 * 8)
    tb_rows = max(8, _round_up(max(1, 512 // L), 8))  # aim for TB*L ~ 512 matmul rows
    tb = min(_round_up(N, 8), tb_vmem, tb_rows)
    if two_cores:
        # v7x: prefer >= 4 grid steps so each of the 2 TensorCores gets >= 2
        # pipelined steps, but never drop tb below the 8-row alignment floor.
        while tb > 8 and _round_up(N, tb) // tb < 4:
            tb -= 8
    return tb


def _ssl_encoder_kernel(x_ref, w1_ref, b1_ref, w2_ref, b2_ref, out_ref, h1p_ref,
                        *, TB, L, K, pad, inv_L, fuse_conv2):
    """Per-batch-block kernel.

    x_ref  : (TB, Lp, C_in)       bf16  zero-padded input, channels last
    w1_ref : (K, C_in, H)         bf16  conv1 weights, one (C_in, H) per tap
    b1_ref : (1, H)               f32
    w2_ref : (K*H, H) or (K,H,H)  bf16  conv2 weights (fused / per-tap layout)
    b2_ref : (1, H)               f32
    out_ref: (TB, H)              f32   mean over L of relu(conv2(relu(conv1(x))))
    h1p_ref: (TB, Lp, H)          bf16  VMEM scratch holding zero-padded h1
    """
    H = out_ref.shape[1]
    C_in = x_ref.shape[2]

    # ---- conv1: in-kernel im2col as K shifted dots of depth C_in ----
    acc1 = jnp.zeros((TB * L, H), jnp.float32)
    for k in range(K):  # static unroll (K=3)
        xk = x_ref[:, k:k + L, :].reshape(TB * L, C_in)            # bf16
        acc1 = acc1 + jnp.dot(xk, w1_ref[k], preferred_element_type=jnp.float32)
    h1 = jnp.maximum(acc1 + b1_ref[...], 0.0)                      # (TB*L, H) f32

    # ---- stage zero-padded h1 into VMEM scratch with ONE contiguous store ----
    zrows = jnp.zeros((TB, pad, H), jnp.float32)
    h1p = jnp.concatenate([zrows, h1.reshape(TB, L, H), zrows], axis=1)
    h1p_ref[...] = h1p.astype(h1p_ref.dtype)

    # ---- conv2 ----
    if fuse_conv2:
        # One depth-K*H dot (fills the 256-deep MXU on v6e/v7x, no VPU accumulates).
        h1col = jnp.concatenate([h1p_ref[:, k:k + L, :] for k in range(K)], axis=-1)
        acc2 = jnp.dot(h1col.reshape(TB * L, K * H), w2_ref[...],
                       preferred_element_type=jnp.float32)
    else:
        # K shifted dots of depth H (128-deep MXU on <=v5 is already full).
        acc2 = jnp.zeros((TB * L, H), jnp.float32)
        for k in range(K):
            h1k = h1p_ref[:, k:k + L, :].reshape(TB * L, H)
            acc2 = acc2 + jnp.dot(h1k, w2_ref[k], preferred_element_type=jnp.float32)
    h2 = jnp.maximum(acc2 + b2_ref[...], 0.0)                      # (TB*L, H) f32

    # ---- mean over L: sublane reduce, then scale by precomputed 1/L ----
    out_ref[...] = (jnp.sum(h2.reshape(TB, L, H), axis=1) * inv_L).astype(out_ref.dtype)


def ssl_encoder(x_ncl, w1, b1, w2, b2, *, tb=None, fuse_conv2=None):
    """Pallas implementation of SSLEncoder.forward.

    x_ncl: (N, C_in, L)  (PyTorch NCL layout)
    w1   : (H, C_in, K)  b1: (H,)
    w2   : (H, H, K)     b2: (H,)
    returns (N, H) float32
    """
    N, C_in, L = x_ncl.shape
    H, _, K = w1.shape
    assert K % 2 == 1, "odd kernel_size expected (module uses K=3, padding=1)"
    pad = (K - 1) // 2
    Lp = L + 2 * pad

    kind = _tpu_kind()
    two_cores = ("v7" in kind) or ("7x" in kind)
    if fuse_conv2 is None:
        # 256-deep MXU (v6e/v7x): fuse conv2 taps. 128-deep MXU (<=v5): keep 3 dots.
        fuse_conv2 = not any(g in kind for g in ("v2", "v3", "v4", "v5"))
    if tb is None:
        tb = _pick_tb(N, L, Lp, H, C_in, two_cores)
    tb = min(tb, _round_up(N, 8))

    # Pad N up to a multiple of tb (and to an even grid on v7x) instead of
    # shrinking tb; extra rows are zero-input and sliced off the output.
    N_pad = _round_up(N, tb)
    if two_cores and (N_pad // tb) > 1 and (N_pad // tb) % 2 == 1:
        N_pad += tb

    # ---- wrapper-side layout glue (no im2col slab: just transpose + pad + cast) ----
    x = jnp.transpose(x_ncl, (0, 2, 1)).astype(jnp.bfloat16)       # (N, L, C_in)
    xp = jnp.pad(x, ((0, N_pad - N), (pad, pad), (0, 0)))          # (N_pad, Lp, C_in)

    w1t = jnp.transpose(w1, (2, 1, 0)).astype(jnp.bfloat16)        # (K, C_in, H)
    if fuse_conv2:
        w2k = jnp.transpose(w2, (2, 1, 0)).reshape(K * H, H).astype(jnp.bfloat16)
        w2_spec = pl.BlockSpec((K * H, H), lambda b: (0, 0))
    else:
        w2k = jnp.transpose(w2, (2, 1, 0)).astype(jnp.bfloat16)    # (K, H, H)
        w2_spec = pl.BlockSpec((K, H, H), lambda b: (0, 0, 0))
    b1r = b1.reshape(1, H).astype(jnp.float32)
    b2r = b2.reshape(1, H).astype(jnp.float32)

    kernel = functools.partial(_ssl_encoder_kernel, TB=tb, L=L, K=K, pad=pad,
                               inv_L=float(1.0 / L), fuse_conv2=fuse_conv2)

    out = pl.pallas_call(
        kernel,
        out_shape=jax.ShapeDtypeStruct((N_pad, H), jnp.float32),
        grid_spec=pltpu.PrefetchScalarGridSpec(
            num_scalar_prefetch=0,
            grid=(N_pad // tb,),
            in_specs=[
                pl.BlockSpec((tb, Lp, C_in), lambda b: (b, 0, 0)),  # padded input
                pl.BlockSpec((K, C_in, H), lambda b: (0, 0, 0)),    # w1 (grid-invariant)
                pl.BlockSpec((1, H), lambda b: (0, 0)),             # b1
                w2_spec,                                            # w2 (grid-invariant)
                pl.BlockSpec((1, H), lambda b: (0, 0)),             # b2
            ],
            out_specs=pl.BlockSpec((tb, H), lambda b: (b, 0)),      # lane-dense (tb, 128)
            scratch_shapes=[pltpu.VMEM((tb, Lp, H), jnp.bfloat16)],
        ),
        compiler_params=pltpu.CompilerParams(
            dimension_semantics=("parallel",),
        ),
    )(xp, w1t, b1r, w2k, b2r)
    return out[:N]


def ssl_encoder_ref(x_ncl, w1, b1, w2, b2):
    """Pure-JAX float32 reference (same math as the PyTorch module)."""
    N, C_in, L = x_ncl.shape
    H, _, K = w1.shape
    pad = (K - 1) // 2
    x = jnp.transpose(x_ncl, (0, 2, 1)).astype(jnp.float32)
    xp = jnp.pad(x, ((0, 0), (pad, pad), (0, 0)))
    w1t = jnp.transpose(w1, (2, 1, 0)).astype(jnp.float32)
    w2t = jnp.transpose(w2, (2, 1, 0)).astype(jnp.float32)

    h1 = sum(jnp.einsum("nlc,ch->nlh", xp[:, k:k + L, :], w1t[k]) for k in range(K))
    h1 = jax.nn.relu(h1 + b1.reshape(1, 1, H))
    h1p = jnp.pad(h1, ((0, 0), (pad, pad), (0, 0)))
    h2 = sum(jnp.einsum("nlc,ch->nlh", h1p[:, k:k + L, :], w2t[k]) for k in range(K))
    h2 = jax.nn.relu(h2 + b2.reshape(1, 1, H))
    return jnp.mean(h2, axis=1)


if __name__ == "__main__":
    # Small shapes consistent with the module defaults: input_dim=3, hidden_dim=128.
    N, C_IN, L, H, K = 16, 3, 16, 128, 3

    key = jax.random.PRNGKey(0)
    kx, kw1, kb1, kw2, kb2 = jax.random.split(key, 5)

    x = jax.random.normal(kx, (N, C_IN, L), dtype=jnp.float32)
    w1 = jax.random.normal(kw1, (H, C_IN, K), dtype=jnp.float32) * 0.1
    b1 = jax.random.normal(kb1, (H,), dtype=jnp.float32) * 0.1
    w2 = jax.random.normal(kw2, (H, H, K), dtype=jnp.float32) * 0.1
    b2 = jax.random.normal(kb2, (H,), dtype=jnp.float32) * 0.1

    # tb / conv2-fusion chosen automatically per TPU generation:
    #   v5e/v6e (1 TC): tb=16, grid=(1,);  v7x (2 TCs): tb=8, grid=(2,) even.
    out = jax.block_until_ready(ssl_encoder(x, w1, b1, w2, b2))
    ref = jax.block_until_ready(ssl_encoder_ref(x, w1, b1, w2, b2))

    # Tolerance accounts for bf16 matmul operands (f32 accumulation) in the kernel.
    np.testing.assert_allclose(np.asarray(out), np.asarray(ref), rtol=2e-2, atol=3e-2)
    assert out.shape == (N, H)
    print("KERNEL_OK")
</pallas_src>

<mosaic_0001>
module attributes {stable_mosaic.version = 11 : i64} {
  func.func @_ssl_encoder_kernel(%arg0: i32, %arg1: memref<16x18x3xbf16, #tpu.memory_space<vmem>>, %arg2: memref<3x3x128xbf16, #tpu.memory_space<vmem>>, %arg3: memref<1x128xf32, #tpu.memory_space<vmem>>, %arg4: memref<384x128xbf16, #tpu.memory_space<vmem>>, %arg5: memref<1x128xf32, #tpu.memory_space<vmem>>, %arg6: memref<16x128xf32, #tpu.memory_space<vmem>>, %arg7: memref<16x18x128xbf16, #tpu.memory_space<vmem>>) attributes {dimension_semantics = [#tpu.dimension_semantics<parallel>], iteration_bounds = array<i64: 1>, scalar_prefetch = 0 : i64, scratch_operands = 1 : i64, tpu.core_type = #tpu.core_type<tc>, window_params = [{transform_indices = @transform_0, window_bounds = array<i64: 16, 18, 3>}, {pipeline_mode = #tpu.pipeline_mode<synchronous>, transform_indices = @transform_1, window_bounds = array<i64: 3, 3, 128>}, {pipeline_mode = #tpu.pipeline_mode<synchronous>, transform_indices = @transform_2, window_bounds = array<i64: 1, 128>}, {pipeline_mode = #tpu.pipeline_mode<synchronous>, transform_indices = @transform_3, window_bounds = array<i64: 384, 128>}, {pipeline_mode = #tpu.pipeline_mode<synchronous>, transform_indices = @transform_4, window_bounds = array<i64: 1, 128>}, {transform_indices = @transform_5, window_bounds = array<i64: 16, 128>}]} {
    %cst = arith.constant 0.000000e+00 : f32
    %0 = vector.broadcast %cst : f32 to vector<256x128xf32>
    %c0 = arith.constant 0 : index
    %c0_0 = arith.constant 0 : index
    %c0_1 = arith.constant 0 : index
    %1 = vector.load %arg1[%c0, %c0_0, %c0_1] : memref<16x18x3xbf16, #tpu.memory_space<vmem>>, vector<16x16x3xbf16>
    %2 = vector.shape_cast %1 : vector<16x16x3xbf16> to vector<256x3xbf16>
    %c0_2 = arith.constant 0 : index
    %c0_3 = arith.constant 0 : index
    %c0_4 = arith.constant 0 : index
    %3 = vector.load %arg2[%c0_2, %c0_3, %c0_4] : memref<3x3x128xbf16, #tpu.memory_space<vmem>>, vector<1x3x128xbf16>
    %4 = vector.shape_cast %3 : vector<1x3x128xbf16> to vector<3x128xbf16>
    %cst_5 = arith.constant dense<0.000000e+00> : vector<256x128xf32>
    %5 = tpu.matmul %2, %4, %cst_5 {dimension_numbers = #tpu.dot_dimension_numbers<[1], [0], [0], [1], [0, 0, 1, 1], [], []>} : vector<256x3xbf16>, vector<3x128xbf16>, vector<256x128xf32> -> vector<256x128xf32>
    %6 = arith.addf %0, %5 : vector<256x128xf32>
    %c0_6 = arith.constant 0 : index
    %c1 = arith.constant 1 : index
    %c0_7 = arith.constant 0 : index
    %7 = vector.load %arg1[%c0_6, %c1, %c0_7] : memref<16x18x3xbf16, #tpu.memory_space<vmem>>, vector<16x16x3xbf16>
    %8 = vector.shape_cast %7 : vector<16x16x3xbf16> to vector<256x3xbf16>
    %c1_8 = arith.constant 1 : index
    %c0_9 = arith.constant 0 : index
    %c0_10 = arith.constant 0 : index
    %9 = vector.load %arg2[%c1_8, %c0_9, %c0_10] : memref<3x3x128xbf16, #tpu.memory_space<vmem>>, vector<1x3x128xbf16>
    %10 = vector.shape_cast %9 : vector<1x3x128xbf16> to vector<3x128xbf16>
    %cst_11 = arith.constant dense<0.000000e+00> : vector<256x128xf32>
    %11 = tpu.matmul %8, %10, %cst_11 {dimension_numbers = #tpu.dot_dimension_numbers<[1], [0], [0], [1], [0, 0, 1, 1], [], []>} : vector<256x3xbf16>, vector<3x128xbf16>, vector<256x128xf32> -> vector<256x128xf32>
    %12 = arith.addf %6, %11 : vector<256x128xf32>
    %c0_12 = arith.constant 0 : index
    %c2 = arith.constant 2 : index
    %c0_13 = arith.constant 0 : index
    %13 = vector.load %arg1[%c0_12, %c2, %c0_13] : memref<16x18x3xbf16, #tpu.memory_space<vmem>>, vector<16x16x3xbf16>
    %14 = vector.shape_cast %13 : vector<16x16x3xbf16> to vector<256x3xbf16>
    %c2_14 = arith.constant 2 : index
    %c0_15 = arith.constant 0 : index
    %c0_16 = arith.constant 0 : index
    %15 = vector.load %arg2[%c2_14, %c0_15, %c0_16] : memref<3x3x128xbf16, #tpu.memory_space<vmem>>, vector<1x3x128xbf16>
    %16 = vector.shape_cast %15 : vector<1x3x128xbf16> to vector<3x128xbf16>
    %cst_17 = arith.constant dense<0.000000e+00> : vector<256x128xf32>
    %17 = tpu.matmul %14, %16, %cst_17 {dimension_numbers = #tpu.dot_dimension_numbers<[1], [0], [0], [1], [0, 0, 1, 1], [], []>} : vector<256x3xbf16>, vector<3x128xbf16>, vector<256x128xf32> -> vector<256x128xf32>
    %18 = arith.addf %12, %17 : vector<256x128xf32>
    %c0_18 = arith.constant 0 : index
    %c0_19 = arith.constant 0 : index
    %19 = vector.load %arg3[%c0_18, %c0_19] : memref<1x128xf32, #tpu.memory_space<vmem>>, vector<1x128xf32>
    %20 = vector.broadcast %19 : vector<1x128xf32> to vector<256x128xf32>
    %21 = arith.addf %18, %20 : vector<256x128xf32>
    %cst_20 = arith.constant 0.000000e+00 : f32
    %22 = vector.broadcast %cst_20 : f32 to vector<256x128xf32>
    %23 = arith.maximumf %21, %22 : vector<256x128xf32>
    %cst_21 = arith.constant 0.000000e+00 : f32
    %24 = vector.broadcast %cst_21 : f32 to vector<16x1x128xf32>
    %25 = vector.shape_cast %23 : vector<256x128xf32> to vector<16x16x128xf32>
    %26 = tpu.concatenate %24, %25, %24 in 1 : vector<16x1x128xf32>, vector<16x16x128xf32>, vector<16x1x128xf32> -> vector<16x18x128xf32>
    %27 = arith.truncf %26 : vector<16x18x128xf32> to vector<16x18x128xbf16>
    %c0_22 = arith.constant 0 : index
    %c0_23 = arith.constant 0 : index
    %c0_24 = arith.constant 0 : index
    %28 = vector.load %arg7[%c0_22, %c0_23, %c0_24] : memref<16x18x128xbf16, #tpu.memory_space<vmem>>, vector<16x18x128xbf16>
    tpu.vector_store %arg7[%c0_22, %c0_23, %c0_24], %27 {strides = array<i32>} : memref<16x18x128xbf16, #tpu.memory_space<vmem>>, vector<16x18x128xbf16>,
    %c0_25 = arith.constant 0 : index
    %c0_26 = arith.constant 0 : index
    %c0_27 = arith.constant 0 : index
    %29 = vector.load %arg7[%c0_25, %c0_26, %c0_27] : memref<16x18x128xbf16, #tpu.memory_space<vmem>>, vector<16x16x128xbf16>
    %c0_28 = arith.constant 0 : index
    %c1_29 = arith.constant 1 : index
    %c0_30 = arith.constant 0 : index
    %30 = vector.load %arg7[%c0_28, %c1_29, %c0_30] : memref<16x18x128xbf16, #tpu.memory_space<vmem>>, vector<16x16x128xbf16>
    %c0_31 = arith.constant 0 : index
    %c2_32 = arith.constant 2 : index
    %c0_33 = arith.constant 0 : index
    %31 = vector.load %arg7[%c0_31, %c2_32, %c0_33] : memref<16x18x128xbf16, #tpu.memory_space<vmem>>, vector<16x16x128xbf16>
    %32 = tpu.concatenate %29, %30, %31 in 2 : vector<16x16x128xbf16>, vector<16x16x128xbf16>, vector<16x16x128xbf16> -> vector<16x16x384xbf16>
    %33 = vector.shape_cast %32 : vector<16x16x384xbf16> to vector<256x384xbf16>
    %c0_34 = arith.constant 0 : index
    %c0_35 = arith.constant 0 : index
    %34 = vector.load %arg4[%c0_34, %c0_35] : memref<384x128xbf16, #tpu.memory_space<vmem>>, vector<384x128xbf16>
    %cst_36 = arith.constant dense<0.000000e+00> : vector<256x128xf32>
    %35 = tpu.matmul %33, %34, %cst_36 {dimension_numbers = #tpu.dot_dimension_numbers<[1], [0], [0], [1], [0, 0, 1, 1], [], []>} : vector<256x384xbf16>, vector<384x128xbf16>, vector<256x128xf32> -> vector<256x128xf32>
    %c0_37 = arith.constant 0 : index
    %c0_38 = arith.constant 0 : index
    %36 = vector.load %arg5[%c0_37, %c0_38] : memref<1x128xf32, #tpu.memory_space<vmem>>, vector<1x128xf32>
    %37 = vector.broadcast %36 : vector<1x128xf32> to vector<256x128xf32>
    %38 = arith.addf %35, %37 : vector<256x128xf32>
    %cst_39 = arith.constant 0.000000e+00 : f32
    %39 = vector.broadcast %cst_39 : f32 to vector<256x128xf32>
    %40 = arith.maximumf %38, %39 : vector<256x128xf32>
    %41 = vector.shape_cast %40 : vector<256x128xf32> to vector<16x16x128xf32>
    %cst_40 = arith.constant dense<0.000000e+00> : vector<16x128xf32>
    %42 = vector.multi_reduction <add>, %41, %cst_40 [1] : vector<16x16x128xf32> to vector<16x128xf32>
    %cst_41 = arith.constant 6.250000e-02 : f32
    %43 = vector.broadcast %cst_41 : f32 to vector<16x128xf32>
    %44 = arith.mulf %42, %43 : vector<16x128xf32>
    %c0_42 = arith.constant 0 : index
    %c0_43 = arith.constant 0 : index
    %45 = vector.load %arg6[%c0_42, %c0_43] : memref<16x128xf32, #tpu.memory_space<vmem>>, vector<16x128xf32>
    tpu.vector_store %arg6[%c0_42, %c0_43], %44 {strides = array<i32>} : memref<16x128xf32, #tpu.memory_space<vmem>>, vector<16x128xf32>,
    return
  }
  func.func @transform_0(%arg0: i32) -> (i32, i32, i32) {
    %c0_i32 = arith.constant 0 : i32
    %c0_i32_0 = arith.constant 0 : i32
    %c0_i32_1 = arith.constant 0 : i32
    return %arg0, %c0_i32, %c0_i32_0 : i32, i32, i32
  }
  func.func @transform_1(%arg0: i32) -> (i32, i32, i32) {
    %c0_i32 = arith.constant 0 : i32
    %c0_i32_0 = arith.constant 0 : i32
    %c0_i32_1 = arith.constant 0 : i32
    %c0_i32_2 = arith.constant 0 : i32
    return %c0_i32, %c0_i32_0, %c0_i32_1 : i32, i32, i32
  }
  func.func @transform_2(%arg0: i32) -> (i32, i32) {
    %c0_i32 = arith.constant 0 : i32
    %c0_i32_0 = arith.constant 0 : i32
    %c0_i32_1 = arith.constant 0 : i32
    return %c0_i32, %c0_i32_0 : i32, i32
  }
  func.func @transform_3(%arg0: i32) -> (i32, i32) {
    %c0_i32 = arith.constant 0 : i32
    %c0_i32_0 = arith.constant 0 : i32
    %c0_i32_1 = arith.constant 0 : i32
    return %c0_i32, %c0_i32_0 : i32, i32
  }
  func.func @transform_4(%arg0: i32) -> (i32, i32) {
    %c0_i32 = arith.constant 0 : i32
    %c0_i32_0 = arith.constant 0 : i32
    %c0_i32_1 = arith.constant 0 : i32
    return %c0_i32, %c0_i32_0 : i32, i32
  }
  func.func @transform_5(%arg0: i32) -> (i32, i32) {
    %c0_i32 = arith.constant 0 : i32
    %c0_i32_0 = arith.constant 0 : i32
    return %arg0, %c0_i32 : i32, i32
  }
}

</mosaic_0001>

<bundles_post_ra>
// kernel: tpu_custom_call.1
= control target key start
LH: loop header
LB: loop body
LE: loop exit
PB: predicated region body
PF: predicated region fallthrough
CT: control target
= control target key end

     0   :  { %vm557_vm0 = vcmask 1040384   ;;  %vm558_vm1 = vcmask 1041408   ;;  %v4096_v1 = vmov 65535   ;;  %vm71_vm2 = vsmask.f32 3328  ;;  %s5499_s0 = inlined_call_operand.vmem [shape: bf16[16,18,3], index: 0, kind: input, shape index: {}]   ;;  %s5500_s1 = inlined_call_operand.vmem [shape: bf16[3,3,128], index: 1, kind: input, shape index: {}]   ;;  %s5501_s2 = inlined_call_operand.vmem [shape: f32[1,128], index: 2, kind: input, shape index: {}]   ;;  %s5502_s3 = inlined_call_operand.vmem [shape: bf16[384,128], index: 3, kind: input, shape index: {}]   ;;  %s5503_s4 = inlined_call_operand.vmem [shape: f32[1,128], index: 4, kind: input, shape index: {}]   ;;  %s5504_s5 = inlined_call_operand.hbm [shape: f32[16,128], index: 5, kind: output, shape index: {}]  }
   0x1   :  { %v3229_v0 = vld [vmem:[%s5500_s1 + $0x2] sm:$0x3]  ;;  %v559_v2 = vsel %vm557_vm0, 4294967295, %v4096_v1  ;;  %v4142_v4 = vld [vmem:[%s5499_s0 + $0x4] sm:$0xf]  ;;  %vm508_vm4 = vcmask 23552  }
   0x2   :  { %v4137_v3 = vld [vmem:[%s5499_s0] sm:$0xf]  ;;  %v4144_v5 = vsel %vm558_vm1, %v559_v2, 0  ;;  %v55_v6 = vld [vmem:[%s5499_s0 + $0x8] sm:$0x1]  ;;  %v84_v10 = vshll.u32 %v4142_v4, 16 }
   0x3   :  { %v75_v7 = vshrl.u32 %v4137_v3, 16  ;;  %v562_v8 = vand.u32 %v3229_v0, %v4144_v5  ;;  %vm72_vm3 = vsmask.f32 7440  ;;  %v78_v9 = vshll.u32 %v4137_v3, 16  ;;  %v54_v11 = vld [vmem:[%s5500_s1] sm:$0x3] }
   0x4   :  { %v88_v13 = vshrl.u32 %v4142_v4, 16  ;;  %v94_v14 = vshll.u32 %v55_v6, 16  ;;  %v4160_v15 = vld [vmem:[%s5499_s0 + $0xc] sm:$0xf]  ;;  %v86_v17 = vrot.slane %v84_v10, 5  ;;  %v4163_v18 = vand.u32 %v4144_v5, %v54_v11  ;;  %vm4188_vm5 = vmor %vm71_vm2, %vm72_vm3 }
   0x5   :  { %v77_v12 = vrot.slane %v75_v7, 4  ;;  %3747 = vmatprep.subr.bf16.mxu0 %v562_v8  ;;  %v80_v16 = vrot.slane %v78_v9, 5  ;;  %v4168_v19 = vld [vmem:[%s5499_s0 + $0x10] sm:$0xf]  ;;  %v4173_v20 = vld [vmem:[%s5499_s0 + $0x14] sm:$0x1] }
   0x6   :  { %3748 = vmatpush3.bf16.msra.mxu0 %v562_v8  ;;  %v90_v21 = vrot.slane %v88_v13, 4  ;;  %v99_v22 = vshrl.u32 %v4160_v15, 16  ;;  %v102_v23 = vshll.u32 %v4160_v15, 16  ;;  %v108_v25 = vshll.u32 %v4168_v19, 16  ;;  %v4184_v28 = vld [vmem:[%s5499_s0 + $0x18] sm:$0xf] }
   0x7   :  { %v81_v24 = vor.u32 %v80_v16, %v77_v12  ;;  %3781 = vmatprep.subr.bf16.mxu0 %v4163_v18  ;;  %v112_v26 = vshrl.u32 %v4168_v19, 16  ;;  %v118_v27 = vshll.u32 %v4173_v20, 16  ;;  %v96_v31 = vrot.slane %v94_v14, 5  ;;  %v4195_v34 = vld [vmem:[%s5499_s0 + $0x1c] sm:$0xf] }
   0x8   :  { %v91_v30 = vor.u32 %v90_v21, %v86_v17  ;;  %v101_v32 = vrot.slane %v99_v22, 4  ;;  %v104_v33 = vrot.slane %v102_v23, 5  ;;  %v110_v36 = vrot.slane %v108_v25, 5  ;;  %v4205_v45 = vld [vmem:[%s5499_s0 + $0x20] sm:$0x1] }
   0x9   :  { %v82_v35 = vrot.slane %v81_v24, 4  ;;  %v114_v37 = vrot.slane %v112_v26, 4  ;;  %v120_v41 = vrot.slane %v118_v27, 5  ;;  %v123_v42 = vshrl.u32 %v4184_v28, 16  ;;  %5516 = vst [vmem:[#allocation6_spill] sm:$0xff] %v4205_v45 }
   0xa   :  { %v92_v39 = vrot.slane %v91_v30, 4  ;;  %v105_v40 = vor.u32 %v104_v33, %v101_v32  ;;  %v126_v46 = vshll.u32 %v4184_v28, 16  ;;  %v132_v47 = vshll.u32 %v4195_v34, 16  ;;  %v4212_v48 = vld [vmem:[%s5499_s0 + $0x24] sm:$0xf] }
   0xb   :  { %v87_v43 = vsel %vm4188_vm5, %v82_v35, %v86_v17  ;;  %v115_v44 = vor.u32 %v114_v37, %v110_v36  ;;  %v125_v51 = vrot.slane %v123_v42, 4  ;;  %v136_v52 = vshrl.u32 %v4195_v34, 16  ;;  %v4220_v53 = vld [vmem:[%s5499_s0 + $0x28] sm:$0xf]  ;;  %v4232_v0 = vld [vmem:[%s5499_s0 + $0x2c] sm:$0x1] }
   0xc   :  { %v97_v49 = vsel %vm4188_vm5, %v92_v39, %v96_v31  ;;  %v106_v50 = vrot.slane %v105_v40, 4  ;;  %v128_v56 = vrot.slane %v126_v46, 5  ;;  %v134_v57 = vrot.slane %v132_v47, 5  ;;  %5517 = vst [vmem:[#allocation7_spill] sm:$0xff] %v4232_v0  ;;  %v4239_v6 = vld [vmem:[%s5499_s0 + $0x30] sm:$0xf] }
   0xd   :  { %v3230_v54 = vcombine.low %v87_v43, %v97_v49  ;;  %v116_v55 = vrot.slane %v115_v44, 4  ;;  %v138_v59 = vrot.slane %v136_v52, 4  ;;  %v142_v60 = vshll.u32 %v4205_v45, 16  ;;  %v4244_v11 = vld [vmem:[%s5499_s0 + $0x34] sm:$0xf] }
   0xe   :  { %v111_v58 = vsel %vm4188_vm5, %v106_v50, %v110_v36  ;;  %v147_v61 = vshrl.u32 %v4212_v48, 16  ;;  %v129_v63 = vor.u32 %v128_v56, %v125_v51  ;;  %v150_v1 = vshll.u32 %v4212_v48, 16  ;;  %v4257_v27 = vld [vmem:[%s5499_s0 + $0x38] sm:$0x1]  ;;  %v4263_v31 = vld [vmem:[%s5499_s0 + $0x3c] sm:$0xf] }
   0xf   :  { %3749 = vmatprep.mubr.msk.bf16.mxu0 %vm508_vm4, %v3230_v54  ;;  %v121_v62 = vsel %vm4188_vm5, %v116_v55, %v120_v41  ;;  %v156_v2 = vshll.u32 %v4220_v53, 16  ;;  %v139_v8 = vor.u32 %v138_v59, %v134_v57  ;;  %v144_v9 = vrot.slane %v142_v60, 5  ;;  %v4270_v36 = vld [vmem:[%s5499_s0 + $0x40] sm:$0xf]  ;;  %v4281_v50 = vld [vmem:[%s5499_s0 + $0x44] sm:$0x1] }
  0x10   :  { %v3231_v7 = vcombine.low %v111_v58, %v121_v62  ;;  %v149_v10 = vrot.slane %v147_v61, 4  ;;  %v130_v12 = vrot.slane %v129_v63, 4  ;;  %v152_v13 = vrot.slane %v150_v1, 5  ;;  %v4288_v58 = vld [vmem:[%s5499_s0 + $0x48] sm:$0xf] }
  0x11   :  { %v158_v14 = vrot.slane %v156_v2, 5  ;;  %v160_v16 = vshrl.u32 %v4220_v53, 16  ;;  %v140_v17 = vrot.slane %v139_v8, 4  ;;  %v166_v21 = vshll.u32 %v4232_v0, 16  ;;  %v4296_v63 = vld [vmem:[%s5499_s0 + $0x4c] sm:$0xf] }
  0x12   :  { %3750 = vmatmul.mubr.msk.bf16.vlgmr.msra.gmra.mrb[0].mxu0 %vm508_vm4, %v3231_v7  ;;  %v171_v22 = vshrl.u32 %v4239_v6, 16  ;;  %v174_v23 = vshll.u32 %v4239_v6, 16  ;;  %v135_v24 = vsel %vm4188_vm5, %v130_v12, %v134_v57  ;;  %v153_v25 = vor.u32 %v152_v13, %v149_v10  ;;  %v4304_v12 = vld [vmem:[%s5499_s0 + $0x50] sm:$0x1] }
  0x13   :  { %3782 = vmatpush3.bf16.msra.mxu0 %v4163_v18  ;;  %v162_v26 = vrot.slane %v160_v16, 4  ;;  %v180_v30 = vshll.u32 %v4244_v11, 16  ;;  %v145_v18 = vsel %vm4188_vm5, %v140_v17, %v144_v9  ;;  %v168_v32 = vrot.slane %v166_v21, 5 }
  0x14   :  { %v173_v33 = vrot.slane %v171_v22, 4  ;;  %v176_v35 = vrot.slane %v174_v23, 5  ;;  %v3232_v37 = vcombine.low %v135_v24, %v145_v18  ;;  %v154_v39 = vrot.slane %v153_v25, 4 }
  0x15   :  { %v163_v40 = vor.u32 %v162_v26, %v158_v14  ;;  %v182_v41 = vrot.slane %v180_v30, 5  ;;  %v184_v43 = vshrl.u32 %v4244_v11, 16  ;;  %v190_v44 = vshll.u32 %v4257_v27, 16  ;;  %v4314_v30 = vld [vmem:[%s5499_s0 + $0x54] sm:$0xf] }
  0x16   :  { %v177_v42 = vor.u32 %v176_v35, %v173_v33  ;;  %v195_v46 = vshrl.u32 %v4263_v31, 16  ;;  %3753 = vmatprep.mubr.msk.bf16.mxu0 %vm508_vm4, %v3232_v37  ;;  %v159_v47 = vsel %vm4188_vm5, %v154_v39, %v158_v14  ;;  %v198_v51 = vshll.u32 %v4263_v31, 16  ;;  %v4322_v37 = vld [vmem:[%s5499_s0 + $0x58] sm:$0xf] }
  0x17   :  { %v164_v49 = vrot.slane %v163_v40, 4  ;;  %v204_v52 = vshll.u32 %v4270_v36, 16  ;;  %v186_v55 = vrot.slane %v184_v43, 4  ;;  %v192_v56 = vrot.slane %v190_v44, 5 }
  0x18   :  { %v178_v54 = vrot.slane %v177_v42, 4  ;;  %v197_v57 = vrot.slane %v195_v46, 4  ;;  %v200_v60 = vrot.slane %v198_v51, 5  ;;  %v208_v62 = vshrl.u32 %v4270_v36, 16  ;;  %v4329_v46 = vld [vmem:[%s5499_s0 + $0x5c] sm:$0x1] }
  0x19   :  { %v169_v59 = vsel %vm4188_vm5, %v164_v49, %v168_v32  ;;  %v206_v61 = vrot.slane %v204_v52, 5  ;;  %v187_v7 = vor.u32 %v186_v55, %v182_v41  ;;  %v214_v8 = vshll.u32 %v4281_v50, 16 }
  0x1a   :  { %v3233_v1 = vcombine.low %v159_v47, %v169_v59  ;;  %v183_v2 = vsel %vm4188_vm5, %v178_v54, %v182_v41  ;;  %v201_v9 = vor.u32 %v200_v60, %v197_v57  ;;  %v210_v10 = vrot.slane %v208_v62, 4  ;;  %v4346_v62 = vld [vmem:[%s5499_s0 + $0x64] sm:$0xf] }
  0x1b   :  { %v219_v13 = vshrl.u32 %v4288_v58, 16  ;;  %v222_v14 = vshll.u32 %v4288_v58, 16  ;;  %v188_v16 = vrot.slane %v187_v7, 4  ;;  %v216_v17 = vrot.slane %v214_v8, 5 }
  0x1c   :  { %3754 = vmatmul.mubr.msk.bf16.gmra.mrb[4].mxu0 %vm508_vm4, %v3233_v1  ;;  %v228_v21 = vshll.u32 %v4296_v63, 16  ;;  %v232_v22 = vshrl.u32 %v4296_v63, 16  ;;  %v202_v23 = vrot.slane %v201_v9, 4  ;;  %v211_v24 = vor.u32 %v210_v10, %v206_v61 }
  0x1d   :  { %v221_v25 = vrot.slane %v219_v13, 4  ;;  %v224_v26 = vrot.slane %v222_v14, 5  ;;  %v193_v18 = vsel %vm4188_vm5, %v188_v16, %v192_v56  ;;  %v238_v35 = vshll.u32 %v4304_v12, 16  ;;  %v4341_v56 = vld [vmem:[%s5499_s0 + $0x60] sm:$0xf] }
  0x1e   :  { %v230_v32 = vrot.slane %v228_v21, 5  ;;  %v234_v33 = vrot.slane %v232_v22, 4  ;;  %v3234_v39 = vcombine.low %v183_v2, %v193_v18  ;;  %v207_v40 = vsel %vm4188_vm5, %v202_v23, %v206_v61  ;;  %v4357_v13 = vld [vmem:[%s5499_s0 + $0x68] sm:$0x1] }
  0x1f   :  { %v212_v41 = vrot.slane %v211_v24, 4  ;;  %v225_v42 = vor.u32 %v224_v26, %v221_v25  ;;  %v240_v44 = vrot.slane %v238_v35, 5  ;;  %v243_v47 = vshrl.u32 %v4314_v30, 16  ;;  %5518 = vst [vmem:[#allocation8_spill] sm:$0xff] %v4357_v13 }
  0x20   :  { %v235_v43 = vor.u32 %v234_v33, %v230_v32  ;;  %v246_v49 = vshll.u32 %v4314_v30, 16  ;;  %3757 = vmatprep.mubr.msk.bf16.mxu0 %vm508_vm4, %v3234_v39  ;;  %v252_v54 = vshll.u32 %v4322_v37, 16  ;;  %v256_v55 = vshrl.u32 %v4322_v37, 16  ;;  %v4371_v33 = vld [vmem:[%s5499_s0 + $0x70] sm:$0xf] }
  0x21   :  { %v217_v51 = vsel %vm4188_vm5, %v212_v41, %v216_v17  ;;  %v226_v52 = vrot.slane %v225_v42, 4  ;;  %v245_v60 = vrot.slane %v243_v47, 4  ;;  %v262_v8 = vshll.u32 %v4329_v46, 16  ;;  %v4364_v17 = vld [vmem:[%s5499_s0 + $0x6c] sm:$0xf] }
  0x22   :  { %v3235_v57 = vcombine.low %v207_v40, %v217_v51  ;;  %v236_v59 = vrot.slane %v235_v43, 4  ;;  %v248_v61 = vrot.slane %v246_v49, 5  ;;  %v254_v2 = vrot.slane %v252_v54, 5  ;;  %v4381_v47 = vld [vmem:[%s5499_s0 + $0x74] sm:$0x1] }
  0x23   :  { %v231_v1 = vsel %vm4188_vm5, %v226_v52, %v230_v32  ;;  %v258_v7 = vrot.slane %v256_v55, 4  ;;  %v267_v14 = vshrl.u32 %v4341_v56, 16  ;;  %v270_v16 = vshll.u32 %v4341_v56, 16  ;;  %5519 = vst [vmem:[#allocation9_spill] sm:$0xff] %v4381_v47  ;;  %v4387_v51 = vld [vmem:[%s5499_s0 + $0x78] sm:$0xf] }
  0x24   :  { %3758 = vmatmul.mubr.msk.bf16.gmra.mrb[8].mxu0 %vm508_vm4, %v3235_v57  ;;  %v241_v9 = vsel %vm4188_vm5, %v236_v59, %v240_v44  ;;  %v249_v10 = vor.u32 %v248_v61, %v245_v60  ;;  %v264_v23 = vrot.slane %v262_v8, 5  ;;  %v276_v24 = vshll.u32 %v4346_v62, 16 }
  0x25   :  { %v3236_v21 = vcombine.low %v231_v1, %v241_v9  ;;  %v259_v22 = vor.u32 %v258_v7, %v254_v2  ;;  %v269_v26 = vrot.slane %v267_v14, 4  ;;  %v272_v18 = vrot.slane %v270_v16, 5 }
  0x26   :  { %v250_v25 = vrot.slane %v249_v10, 4  ;;  %v280_v32 = vshrl.u32 %v4346_v62, 16  ;;  %v278_v39 = vrot.slane %v276_v24, 5  ;;  %v286_v40 = vshll.u32 %v4357_v13, 16  ;;  %v4402_v10 = vld [vmem:[%s5499_s0 + $0x80] sm:$0x1] }
  0x27   :  { %3761 = vmatprep.mubr.msk.bf16.mxu0 %vm508_vm4, %v3236_v21  ;;  %v260_v35 = vrot.slane %v259_v22, 4  ;;  %v291_v41 = vshrl.u32 %v4364_v17, 16  ;;  %v273_v43 = vor.u32 %v272_v18, %v269_v26  ;;  %v294_v49 = vshll.u32 %v4364_v17, 16  ;;  %5520 = vst [vmem:[#allocation10_spill] sm:$0xff] %v4402_v10  ;;  %v4412_v24 = vld [vmem:[%s5499_s0 + $0x84] sm:$0xf] }
  0x28   :  { %v255_v42 = vsel %vm4188_vm5, %v250_v25, %v254_v2  ;;  %v282_v44 = vrot.slane %v280_v32, 4  ;;  %v288_v54 = vrot.slane %v286_v40, 5  ;;  %v300_v57 = vshll.u32 %v4371_v33, 16  ;;  %v4395_v2 = vld [vmem:[%s5499_s0 + $0x7c] sm:$0xf] }
  0x29   :  { %v265_v52 = vsel %vm4188_vm5, %v260_v35, %v264_v23  ;;  %v293_v55 = vrot.slane %v291_v41, 4  ;;  %v274_v60 = vrot.slane %v273_v43, 4  ;;  %v296_v1 = vrot.slane %v294_v49, 5  ;;  %v4417_v25 = vld [vmem:[%s5499_s0 + $0x88] sm:$0xf] }
  0x2a   :  { %v3237_v59 = vcombine.low %v255_v42, %v265_v52  ;;  %v283_v61 = vor.u32 %v282_v44, %v278_v39  ;;  %v302_v7 = vrot.slane %v300_v57, 5  ;;  %v304_v8 = vshrl.u32 %v4371_v33, 16 }
  0x2b   :  { %v310_v9 = vshll.u32 %v4381_v47, 16  ;;  %v315_v14 = vshrl.u32 %v4387_v51, 16  ;;  %v279_v16 = vsel %vm4188_vm5, %v274_v60, %v278_v39  ;;  %v297_v22 = vor.u32 %v296_v1, %v293_v55  ;;  %v4427_v55 = vld [vmem:[%s5499_s0 + $0x8c] sm:$0x1] }
  0x2c   :  { %3762 = vmatmul.mubr.msk.bf16.gmra.mrb[12].mxu0 %vm508_vm4, %v3237_v59  ;;  %v284_v21 = vrot.slane %v283_v61, 4  ;;  %v318_v23 = vshll.u32 %v4387_v51, 16  ;;  %v306_v26 = vrot.slane %v304_v8, 4  ;;  %v324_v35 = vshll.u32 %v4395_v2, 16  ;;  %5521 = vst [vmem:[#allocation11_spill] sm:$0xff] %v4427_v55 }
  0x2d   :  { %v312_v18 = vrot.slane %v310_v9, 5  ;;  %v317_v32 = vrot.slane %v315_v14, 4  ;;  %v298_v40 = vrot.slane %v297_v22, 4  ;;  %v328_v42 = vshrl.u32 %v4395_v2, 16  ;;  %v4435_v61 = vld [vmem:[%s5499_s0 + $0x90] sm:$0xf] }
  0x2e   :  { %v289_v39 = vsel %vm4188_vm5, %v284_v21, %v288_v54  ;;  %v320_v41 = vrot.slane %v318_v23, 5  ;;  %v307_v44 = vor.u32 %v306_v26, %v302_v7  ;;  %v326_v49 = vrot.slane %v324_v35, 5 }
  0x2f   :  { %v3238_v43 = vcombine.low %v279_v16, %v289_v39  ;;  %v334_v52 = vshll.u32 %v4402_v10, 16  ;;  %v303_v57 = vsel %vm4188_vm5, %v298_v40, %v302_v7  ;;  %v330_v60 = vrot.slane %v328_v42, 4  ;;  %v4443_v7 = vld [vmem:[%s5499_s0 + $0x94] sm:$0xf]  ;;  %v4452_v40 = vld [vmem:[%s5499_s0 + $0x98] sm:$0x1] }
  0x30   :  { %v321_v59 = vor.u32 %v320_v41, %v317_v32  ;;  %v339_v54 = vshrl.u32 %v4412_v24, 16  ;;  %v308_v1 = vrot.slane %v307_v44, 4  ;;  %v342_v9 = vshll.u32 %v4412_v24, 16  ;;  %5522 = vst [vmem:[#allocation12_spill] sm:$0xff] %v4452_v40 }
  0x31   :  { %3765 = vmatprep.mubr.msk.bf16.mxu0 %vm508_vm4, %v3238_v43  ;;  %v336_v8 = vrot.slane %v334_v52, 5  ;;  %v348_v14 = vshll.u32 %v4417_v25, 16  ;;  %v331_v21 = vor.u32 %v330_v60, %v326_v49  ;;  %v352_v23 = vshrl.u32 %v4417_v25, 16  ;;  %v4459_v52 = vld [vmem:[%s5499_s0 + $0x9c] sm:$0xf] }
  0x32   :  { %v322_v16 = vrot.slane %v321_v59, 4  ;;  %v341_v22 = vrot.slane %v339_v54, 4  ;;  %v313_v26 = vsel %vm4188_vm5, %v308_v1, %v312_v18  ;;  %v344_v32 = vrot.slane %v342_v9, 5 }
  0x33   :  { %v350_v35 = vrot.slane %v348_v14, 5  ;;  %v358_v39 = vshll.u32 %v4427_v55, 16  ;;  %v3239_v41 = vcombine.low %v303_v57, %v313_v26  ;;  %v332_v43 = vrot.slane %v331_v21, 4  ;;  %v4466_v57 = vld [vmem:[%s5499_s0 + $0xa0] sm:$0xf] }
  0x34   :  { %v327_v42 = vsel %vm4188_vm5, %v322_v16, %v326_v49  ;;  %v354_v44 = vrot.slane %v352_v23, 4  ;;  %v345_v18 = vor.u32 %v344_v32, %v341_v22  ;;  %v363_v60 = vshrl.u32 %v4435_v61, 16  ;;  %v4476_v26 = vld [vmem:[%s5499_s0 + $0xa4] sm:$0x1] }
  0x35   :  { %v360_v59 = vrot.slane %v358_v39, 5  ;;  %v366_v54 = vshll.u32 %v4435_v61, 16  ;;  %3766 = vmatmul.mubr.msk.bf16.gmra.mrb[16].mxu0 %vm508_vm4, %v3239_v41  ;;  %v337_v49 = vsel %vm4188_vm5, %v332_v43, %v336_v8  ;;  %v372_v9 = vshll.u32 %v4443_v7, 16  ;;  %5523 = vst [vmem:[#allocation13_spill] sm:$0xff] %v4476_v26  ;;  %v4482_v8 = vld [vmem:[%s5499_s0 + $0xa8] sm:$0xf] }
  0x36   :  { %v355_v1 = vor.u32 %v354_v44, %v350_v35  ;;  %v376_v14 = vshrl.u32 %v4443_v7, 16  ;;  %v3240_v16 = vcombine.low %v327_v42, %v337_v49  ;;  %v346_v21 = vrot.slane %v345_v18, 4 }
  0x37   :  { %v365_v22 = vrot.slane %v363_v60, 4  ;;  %v368_v23 = vrot.slane %v366_v54, 5  ;;  %v374_v39 = vrot.slane %v372_v9, 5  ;;  %v382_v38 = vshll.u32 %v4452_v40, 16  ;;  %v4492_v60 = vld [vmem:[%s5499_s0 + $0xac] sm:$0xf] }
  0x38   :  { %v356_v32 = vrot.slane %v355_v1, 4  ;;  %v378_v41 = vrot.slane %v376_v14, 4  ;;  %3769 = vmatprep.mubr.msk.bf16.mxu0 %vm508_vm4, %v3240_v16  ;;  %v351_v42 = vsel %vm4188_vm5, %v346_v21, %v350_v35  ;;  %v387_v44 = vshrl.u32 %v4459_v52, 16 }
  0x39   :  { %v369_v43 = vor.u32 %v368_v23, %v365_v22  ;;  %v390_v18 = vshll.u32 %v4459_v52, 16  ;;  %v384_v1 = vrot.slane %v382_v38, 5  ;;  %v396_v9 = vshll.u32 %v4466_v57, 16  ;;  %v4500_v22 = vld [vmem:[%s5499_s0 + $0xb0] sm:$0x1] }
  0x3a   :  { %v361_v54 = vsel %vm4188_vm5, %v356_v32, %v360_v59  ;;  %v379_v49 = vor.u32 %v378_v41, %v374_v39  ;;  %v389_v35 = vrot.slane %v387_v44, 4  ;;  %5524 = vst [vmem:[#allocation14_spill] sm:$0xff] %v4500_v22  ;;  %v400_v45 = vshrl.u32 %v4466_v57, 16  ;;  %v4507_v38 = vld [vmem:[%s5499_s0 + $0xb4] sm:$0xf] }
  0x3b   :  { %v3241_v14 = vcombine.low %v351_v42, %v361_v54  ;;  %v370_v16 = vrot.slane %v369_v43, 4  ;;  %v392_v21 = vrot.slane %v390_v18, 5  ;;  %v398_v0 = vrot.slane %v396_v9, 5 }
  0x3c   :  { %v380_v23 = vrot.slane %v379_v49, 4  ;;  %v406_v40 = vshll.u32 %v4476_v26, 16  ;;  %v411_v41 = vshrl.u32 %v4482_v8, 16  ;;  %v414_v42 = vshll.u32 %v4482_v8, 16 }
  0x3d   :  { %v375_v59 = vsel %vm4188_vm5, %v370_v16, %v374_v39  ;;  %v393_v32 = vor.u32 %v392_v21, %v389_v35  ;;  %3770 = vmatmul.mubr.msk.bf16.gmra.mrb[20].mxu0 %vm508_vm4, %v3241_v14  ;;  %v402_v44 = vrot.slane %v400_v45, 4  ;;  %v420_v54 = vshll.u32 %v4492_v60, 16  ;;  %v4520_v39 = vld [vmem:[%s5499_s0 + $0xb8] sm:$0xf]  ;;  %v4527_v45 = vld [vmem:[%s5499_s0 + $0xbc] sm:$0x1] }
  0x3e   :  { %v385_v43 = vsel %vm4188_vm5, %v380_v23, %v384_v1  ;;  %v408_v18 = vrot.slane %v406_v40, 5  ;;  %v413_v26 = vrot.slane %v411_v41, 4  ;;  %v416_v55 = vrot.slane %v414_v42, 5 }
  0x3f   :  { %v3242_v49 = vcombine.low %v375_v59, %v385_v43  ;;  %v394_v9 = vrot.slane %v393_v32, 4  ;;  %v403_v16 = vor.u32 %v402_v44, %v398_v0  ;;  %v422_v35 = vrot.slane %v420_v54, 5  ;;  %v3310_v32 = vld [vmem:[%s5500_s1 + $0x4] sm:$0x3] }
  0x40   :  { %v424_v14 = vshrl.u32 %v4492_v60, 16  ;;  %v430_v21 = vshll.u32 %v4500_v22, 16  ;;  %v417_v1 = vor.u32 %v416_v55, %v413_v26  ;;  %v435_v23 = vshrl.u32 %v4507_v38, 16 }
  0x41   :  { %3773 = vmatprep.mubr.msk.bf16.mxu0 %vm508_vm4, %v3242_v49  ;;  %v399_v40 = vsel %vm4188_vm5, %v394_v9, %v398_v0  ;;  %v438_v59 = vshll.u32 %v4507_v38, 16  ;;  %v404_v41 = vrot.slane %v403_v16, 4  ;;  %v444_v44 = vshll.u32 %v4520_v39, 16 }
  0x42   :  { %v426_v42 = vrot.slane %v424_v14, 4  ;;  %v432_v43 = vrot.slane %v430_v21, 5  ;;  %v418_v54 = vrot.slane %v417_v1, 4  ;;  %v437_v22 = vrot.slane %v435_v23, 4 }
  0x43   :  { %v440_v49 = vrot.slane %v438_v59, 5  ;;  %v448_v10 = vshrl.u32 %v4520_v39, 16  ;;  %v409_v0 = vsel %vm4188_vm5, %v404_v41, %v408_v18  ;;  %v446_v26 = vrot.slane %v444_v44, 5 }
  0x44   :  { %v427_v55 = vor.u32 %v426_v42, %v422_v35  ;;  %v454_v9 = vshll.u32 %v4527_v45, 16  ;;  %v1077_v47 = vrot.slane %v4168_v19, 5  ;;  %v3243_v13 = vcombine.low %v399_v40, %v409_v0 }
  0x45   :  { %v441_v16 = vor.u32 %v440_v49, %v437_v22  ;;  %v450_v14 = vrot.slane %v448_v10, 4  ;;  %v423_v21 = vsel %vm4188_vm5, %v418_v54, %v422_v35  ;;  %v4546_v23 = vand.u32 %v3310_v32, %v4144_v5 }
  0x46   :  { %v428_v1 = vrot.slane %v427_v55, 4  ;;  %v3263_v59 = vcombine.low %v4160_v15, %v4168_v19  ;;  %v1080_v18 = vrot.slane %v4173_v20, 5  ;;  %3774 = vmatmul.mubr.msk.bf16.gmra.mrb[24].mxu0 %vm508_vm4, %v3243_v13  ;;  %v456_v44 = vrot.slane %v454_v9, 5  ;;  %v1018_v20 = vld [vmem:[%s5499_s0 + $0xc] sm:$0xe] }
  0x47   :  { %v442_v41 = vrot.slane %v441_v16, 4  ;;  %v451_v42 = vor.u32 %v450_v14, %v446_v26  ;;  %3815 = vmatprep.subr.bf16.mxu0 %v4546_v23  ;;  %v3266_v22 = vcombine.low %v4239_v6, %v4244_v11  ;;  %v3267_v5 = vcombine.low %v4263_v31, %v4270_v36 }
  0x48   :  { %v433_v10 = vsel %vm4188_vm5, %v428_v1, %v432_v43  ;;  %v3268_v35 = vcombine.low %v4288_v58, %v4296_v63  ;;  %vm1065_vm6 = vcmask 1042432   ;;  %vm1066_vm7 = vcmask 1046532  }
  0x49   :  { %v3244_v13 = vcombine.low %v423_v21, %v433_v10  ;;  %v447_v40 = vsel %vm4188_vm5, %v442_v41, %v446_v26  ;;  %v452_v32 = vrot.slane %v451_v42, 4  ;;  %vm4587_vm8 = vmor %vm1065_vm6, %vm1066_vm7  ;;  %v3295_v29 = vrot.slane %v1018_v20, 9  ;;  %v4609_v20 = vld [vmem:[%s5502_s3] sm:$0xff]  }
  0x4a   :  { %v1079_v42 = vrot.slane %v1077_v47, 4 }
  0x4b   :  { %3777 = vmatprep.mubr.msk.bf16.mxu0 %vm508_vm4, %v3244_v13  ;;  %v457_v26 = vsel %vm4188_vm5, %v452_v32, %v456_v44  ;;  %v1021_v44 = vld [vmem:[%s5499_s0 + $0x30] sm:$0xe]  ;;  %v4597_v10 = vsel %vm4587_vm8, %v3295_v29, %v1077_v47  ;;  %v5527_v32 = vcombine.low %v4137_v3, %v4142_v4 }
  0x4c   :  { %v3245_v21 = vcombine.low %v447_v40, %v457_v26  ;;  %v4601_v13 = vsel %vm4587_vm8, %v1079_v42, %v1080_v18  ;;  %v3997_v40 = vld [vmem:[%s5502_s3 + $0x40] sm:$0xff]  }
  0x4e   :  { %3778 = vmatmul.mubr.msk.bf16.gmra.mrb[28].mxu0 %vm508_vm4, %v3245_v21 }
  0x4f   :  { %3783 = vmatprep.mubr.msk.bf16.mxu0 %vm508_vm4, %v5527_v32 }
  0x50   :  { %10 = vsyncpa [#allocation4], 0  ;;  %v3298_v18 = vrot.slane %v1021_v44, 9  ;;  %v1098_v26 = vrot.slane %v4244_v11, 5  ;;  %v1022_v21 = vld [vmem:[%s5499_s0 + $0x3c] sm:$0xe]  ;;  %3897 = vmatprep.subr.bf16.mxu1 %v3997_v40  ;;  %v3264_v44 = vcombine.low %v4184_v28, %v4195_v34  ;;  %v3265_v16 = vcombine.low %v4212_v48, %v4220_v53 }
  0x51   :  { %v1023_v29 = vld [vmem:[%s5499_s0 + $0x48] sm:$0xe]  ;;  %3905 = vmatpush3.bf16.msra.mxu1 %v4609_v20  ;;  %v1101_v42 = vrot.slane %v4257_v27, 5  ;;  %v3299_v32 = vrot.slane %v1022_v21, 9  ;;  %v1105_v47 = vrot.slane %v4270_v36, 5  ;;  %v1108_v1 = vrot.slane %v4281_v50, 5 }
  0x52   :  { %v4627_v3 = vsel %vm4587_vm8, %v3298_v18, %v1098_v26  ;;  %v1100_v4 = vrot.slane %v1098_v26, 4  ;;  %v1024_v14 = vld [vmem:[%s5499_s0 + $0x54] sm:$0xe]  ;;  %v3300_v27 = vrot.slane %v1023_v29, 9  ;;  %v1112_v26 = vrot.slane %v4296_v63, 5  ;;  %v5531_v0 = vld [vmem:[#allocation11_spill] sm:$0xff] }
  0x53   :  { %v1025_v28 = vld [vmem:[%s5499_s0 + $0x60] sm:$0xe]  ;;  %v4651_v50 = vsel %vm4587_vm8, %v3299_v32, %v1105_v47  ;;  %v1107_v21 = vrot.slane %v1105_v47, 4  ;;  %v1115_v48 = vrot.slane %v4304_v12, 5  ;;  %v1119_v34 = vrot.slane %v4322_v37, 5 }
  0x54   :  { %v4641_v18 = vsel %vm4587_vm8, %v1100_v4, %v1101_v42  ;;  %v4660_v29 = vsel %vm4587_vm8, %v3300_v27, %v1112_v26  ;;  %v1114_v4 = vrot.slane %v1112_v26, 4  ;;  %v3301_v42 = vrot.slane %v1024_v14, 9  ;;  %v1026_v47 = vld [vmem:[%s5499_s0 + $0x6c] sm:$0xe]  ;;  %v1032_v6 = vld [vmem:[%s5499_s0 + $0xb4] sm:$0xe] }
  0x55   :  { %v4667_v12 = vsel %vm4587_vm8, %v1107_v21, %v1108_v1  ;;  %v1122_v15 = vrot.slane %v4329_v46, 5  ;;  %v3302_v19 = vrot.slane %v1025_v28, 9  ;;  %v1027_v46 = vld [vmem:[%s5499_s0 + $0x78] sm:$0xe]  ;;  %v5528_v28 = vld [vmem:[#allocation8_spill] sm:$0xff]  ;;  %v1147_v55 = vrot.slane %v4417_v25, 5 }
  0x56   :  { %3784 = vmatmul.mubr.msk.bf16.vlgmr.msra.gmra.mrb[0].mxu0 %vm508_vm4, %v3263_v59  ;;  %v1126_v59 = vrot.slane %v4346_v62, 5  ;;  %v4682_v1 = vsel %vm4587_vm8, %v3301_v42, %v1119_v34  ;;  %v1129_v21 = vrot.slane %v5528_v28, 5  ;;  %v5529_v42 = vld [vmem:[#allocation9_spill] sm:$0xff]  ;;  %v3304_v28 = vrot.slane %v1027_v46, 9 }
  0x57   :  { %3816 = vmatpush3.bf16.msra.mxu0 %v4546_v23  ;;  %3787 = vmatprep.mubr.msk.bf16.mxu0 %vm508_vm4, %v3264_v44  ;;  %v4678_v23 = vsel %vm4587_vm8, %v1114_v4, %v1115_v48  ;;  %v1121_v44 = vrot.slane %v1119_v34, 4  ;;  %v3303_v34 = vrot.slane %v1026_v47, 9  ;;  %v1133_v4 = vrot.slane %v4371_v33, 5  ;;  %v1029_v47 = vld [vmem:[%s5499_s0 + $0x90] sm:$0xe] }
  0x58   :  { %3611 = vmatprep.subr.bf16.mxu0 %v3997_v40  ;;  %v4691_v27 = vsel %vm4587_vm8, %v3302_v19, %v1126_v59  ;;  %v1128_v26 = vrot.slane %v1126_v59, 4  ;;  %v1136_v14 = vrot.slane %v5529_v42, 5  ;;  %v1028_v40 = vld [vmem:[%s5499_s0 + $0x84] sm:$0xe]  ;;  %v5530_v19 = vld [vmem:[#allocation10_spill] sm:$0xff]  ;;  %v3306_v49 = vrot.slane %v1029_v47, 9 }
  0x59   :  { %v4696_v48 = vsel %vm4587_vm8, %v1121_v44, %v1122_v15  ;;  %v1140_v15 = vrot.slane %v4395_v2, 5  ;;  %v4717_v42 = vsel %vm4587_vm8, %v3303_v34, %v1133_v4  ;;  %v1135_v32 = vrot.slane %v1133_v4, 4 }
  0x5a   :  { %v4707_v59 = vsel %vm4587_vm8, %v1128_v26, %v1129_v21  ;;  %v1143_v9 = vrot.slane %v5530_v19, 5  ;;  %v3305_v21 = vrot.slane %v1028_v40, 9  ;;  %v1150_v34 = vrot.slane %v5531_v0, 5  ;;  %v1030_v19 = vld [vmem:[%s5499_s0 + $0x9c] sm:$0xe] }
  0x5b   :  { %v4722_v26 = vsel %vm4587_vm8, %v3304_v28, %v1140_v15  ;;  %v1142_v46 = vrot.slane %v1140_v15, 4  ;;  %v4728_v44 = vsel %vm4587_vm8, %v1135_v32, %v1136_v14  ;;  %v1154_v4 = vrot.slane %v4443_v7, 5  ;;  %v1031_v40 = vld [vmem:[%s5499_s0 + $0xa8] sm:$0xe]  ;;  %v5532_v28 = vld [vmem:[#allocation12_spill] sm:$0xff] }
  0x5c   :  { %v4747_v0 = vsel %vm4587_vm8, %v3305_v21, %v1147_v55  ;;  %v1149_v32 = vrot.slane %v1147_v55, 4  ;;  %v3307_v47 = vrot.slane %v1030_v19, 9  ;;  %v1161_v55 = vrot.slane %v4466_v57, 5 }
  0x5d   :  { %v4743_v14 = vsel %vm4587_vm8, %v1142_v46, %v1143_v9  ;;  %v4756_v11 = vsel %vm4587_vm8, %v3306_v49, %v1154_v4  ;;  %v1157_v9 = vrot.slane %v5532_v28, 5  ;;  %v5533_v46 = vld [vmem:[#allocation13_spill] sm:$0xff]  ;;  %v3308_v28 = vrot.slane %v1031_v40, 9 }
  0x5e   :  { %3788 = vmatmul.mubr.msk.bf16.gmra.mrb[4].mxu0 %vm508_vm4, %v3265_v16  ;;  %v4761_v15 = vsel %vm4587_vm8, %v1149_v32, %v1150_v34  ;;  %v1164_v21 = vrot.slane %v5533_v46, 5  ;;  %v1168_v34 = vrot.slane %v4492_v60, 5  ;;  %v4779_v32 = vsel %vm4587_vm8, %v3307_v47, %v1161_v55  ;;  %v5534_v16 = vld [vmem:[#allocation14_spill] sm:$0xff] }
  0x5f   :  { %3791 = vmatprep.mubr.msk.bf16.mxu0 %vm508_vm4, %v3266_v22  ;;  %v1156_v22 = vrot.slane %v1154_v4, 4  ;;  %v1163_v46 = vrot.slane %v1161_v55, 4  ;;  %v1171_v54 = vrot.slane %v5534_v16, 5  ;;  %v1175_v40 = vrot.slane %v4520_v39, 5 }
  0x60   :  { %v4784_v49 = vsel %vm4587_vm8, %v3308_v28, %v1168_v34  ;;  %v1170_v43 = vrot.slane %v1168_v34, 4  ;;  %v1178_v19 = vrot.slane %v4527_v45, 5  ;;  %v5537_v58 = vcombine.low %v4364_v17, %v4371_v33  ;;  %v1017_v17 = vld [vmem:[%s5499_s0] sm:$0xe]  ;;  %v4070_v33 = vld [vmem:[%s5499_s0 + $0x8] sm:$0x1] }
  0x61   :  { %v4772_v4 = vsel %vm4587_vm8, %v1156_v22, %v1157_v9  ;;  %v3309_v22 = vrot.slane %v1032_v6, 9  ;;  %v1165_v9 = vsel %vm4587_vm8, %v1163_v46, %v1164_v21  ;;  %v1177_v55 = vrot.slane %v1175_v40, 4 }
  0x62   :  { %v3324_v16 = vcombine.low %v4779_v32, %v1165_v9  ;;  %v1172_v47 = vsel %vm4587_vm8, %v1170_v43, %v1171_v54  ;;  %v5536_v43 = vcombine.low %v4341_v56, %v4346_v62  ;;  %v5538_v63 = vcombine.low %v4387_v51, %v4395_v2  ;;  %v4069_v56 = vld [vmem:[%s5499_s0 + $0x4] sm:$0xf]  ;;  %v4071_v54 = vld [vmem:[%s5499_s0 + $0x1c] sm:$0xf] }
  0x63   :  { %v1176_v6 = vsel %vm4587_vm8, %v3309_v22, %v1175_v40  ;;  %v3325_v45 = vcombine.low %v4784_v49, %v1172_v47  ;;  %v1179_v31 = vsel %vm4587_vm8, %v1177_v55, %v1178_v19  ;;  %v1070_v62 = vrot.slane %v4069_v56, 5  ;;  %v1020_v22 = vld [vmem:[%s5499_s0 + $0x24] sm:$0xe] }
  0x64   :  { %v3326_v36 = vcombine.low %v1176_v6, %v1179_v31  ;;  %v1073_v51 = vrot.slane %v4070_v33, 5  ;;  %v3294_v2 = vrot.slane %v1017_v17, 9  ;;  %v1084_v21 = vrot.slane %v4071_v54, 5 }
  0x65   :  { %v5544_v34 = vcombine.low %v4507_v38, %v4520_v39  ;;  %v1091_v19 = vrot.slane %v4220_v53, 5  ;;  %v3297_v9 = vrot.slane %v1020_v22, 9  ;;  %v5545_v38 = vld [vmem:[#allocation7_spill] sm:$0xff]  ;;  %v5546_v6 = vcombine.low %v4597_v10, %v4601_v13 }
  0x66   :  { %3792 = vmatmul.mubr.msk.bf16.gmra.mrb[8].mxu0 %vm508_vm4, %v3267_v5  ;;  %v5535_v5 = vcombine.low %v4314_v30, %v4322_v37  ;;  %v5539_v30 = vcombine.low %v4412_v24, %v4417_v25  ;;  %v5540_v37 = vcombine.low %v4435_v61, %v4443_v7  ;;  %v1072_v24 = vrot.slane %v1070_v62, 4 }
  0x67   :  { %3795 = vmatprep.mubr.msk.bf16.mxu0 %vm508_vm4, %v3268_v35  ;;  %v5541_v25 = vcombine.low %v4459_v52, %v4466_v57  ;;  %v5542_v61 = vcombine.low %v4482_v8, %v4492_v60  ;;  %v1071_v7 = vsel %vm4587_vm8, %v3294_v2, %v1070_v62  ;;  %v1019_v52 = vld [vmem:[%s5499_s0 + $0x18] sm:$0xe]  ;;  %v1086_v8 = vrot.slane %v1084_v21, 4  ;;  %v5543_v60 = vld [vmem:[#allocation6_spill] sm:$0xff] }
  0x68   :  { %v1074_v35 = vsel %vm4587_vm8, %v1072_v24, %v1073_v51  ;;  %v3296_v49 = vrot.slane %v1019_v52, 9  ;;  %v1087_v28 = vrot.slane %v5543_v60, 5  ;;  %v1093_v47 = vrot.slane %v1091_v19, 4 }
  0x69   :  { %v3311_v57 = vcombine.low %v1071_v7, %v1074_v35  ;;  %v1094_v39 = vrot.slane %v5545_v38, 5  ;;  %v1092_v53 = vsel %vm4587_vm8, %v3297_v9, %v1091_v19  ;;  %v5548_v10 = vcombine.low %v4651_v50, %v4667_v12  ;;  %v3999_v12 = vld [vmem:[%s5502_s3 + $0x48] sm:$0xff]  }
  0x6a   :  { %v1085_v32 = vsel %vm4587_vm8, %v3296_v49, %v1084_v21  ;;  %v1088_v46 = vsel %vm4587_vm8, %v1086_v8, %v1087_v28  ;;  %v5549_v13 = vcombine.low %v4660_v29, %v4678_v23  ;;  %v5550_v41 = vcombine.low %v4682_v1, %v4696_v48  ;;  %v4000_v23 = vld [vmem:[%s5502_s3 + $0x8] sm:$0xff]   ;;  %3898 = vmatprep.subr.bf16.mxu1 %v3999_v12  ;;  %v4001_v1 = vld [vmem:[%s5502_s3 + $0x50] sm:$0xff]   ;;  %v4003_v48 = vld [vmem:[%s5502_s3 + $0x58] sm:$0xff]  }
  0x6b   :  { %v3313_v40 = vcombine.low %v1085_v32, %v1088_v46  ;;  %v1095_v55 = vsel %vm4587_vm8, %v1093_v47, %v1094_v39  ;;  %v5554_v50 = vcombine.low %v4747_v0, %v4761_v15  ;;  %v5555_v29 = vcombine.low %v4756_v11, %v4772_v4  ;;  %3906 = vmatpush3.bf16.msra.mxu1 %v4000_v23  ;;  %v4009_v0 = vld [vmem:[%s5502_s3 + $0x70] sm:$0xff]   ;;  %v4011_v15 = vld [vmem:[%s5502_s3 + $0x78] sm:$0xff]  }
  0x6c   :  { %v3314_v31 = vcombine.low %v1092_v53, %v1095_v55  ;;  %3899 = vmatprep.subr.bf16.mxu1 %v4001_v1  ;;  %v4010_v11 = vld [vmem:[%s5502_s3 + $0x30] sm:$0xff]   ;;  %v4012_v4 = vld [vmem:[%s5502_s3 + $0x38] sm:$0xff]   ;;  %vm2169_vm9 = vsmask.f32 7424  ;;  %vm2426_vm10 = vcmask 1046528   ;;  %vm3188_vm11 = vcmask 1041409  }
  0x6d   :  { %vm3190_vm12 = vcmask 1042434   ;;  %vm3192_vm13 = vcmask 1043459   ;;  %vm3194_vm14 = vcmask 1044484   ;;  %vm3196_vm15 = vcmask 1045509  }
  0x6e   :  { %3796 = vmatmul.mubr.msk.bf16.gmra.mrb[12].mxu0 %vm508_vm4, %v5535_v5  ;;  %v5547_v5 = vcombine.low %v4627_v3, %v4641_v18  ;;  %v5552_v3 = vcombine.low %v4717_v42, %v4728_v44  ;;  %v5553_v18 = vcombine.low %v4722_v26, %v4743_v14  ;;  %v4005_v44 = vld [vmem:[%s5502_s3 + $0x60] sm:$0xff]   ;;  %v4007_v26 = vld [vmem:[%s5502_s3 + $0x68] sm:$0xff]   ;;  %vm3200_vm1 = vcmask 1047559  }
  0x6f   :  { %3799 = vmatprep.mubr.msk.bf16.mxu0 %vm508_vm4, %v5536_v43  ;;  %v4006_v42 = vld [vmem:[%s5502_s3 + $0x20] sm:$0xff]   ;;  %v4008_v14 = vld [vmem:[%s5502_s3 + $0x28] sm:$0xff]  }
  0x76   :  { %3800 = vmatmul.mubr.msk.bf16.gmra.mrb[16].mxu0 %vm508_vm4, %v5537_v58 }
  0x77   :  { %3803 = vmatprep.mubr.msk.bf16.mxu0 %vm508_vm4, %v5538_v63 }
  0x7e   :  { %3804 = vmatmul.mubr.msk.bf16.gmra.mrb[20].mxu0 %vm508_vm4, %v5539_v30 }
  0x7f   :  { %3807 = vmatprep.mubr.msk.bf16.mxu0 %vm508_vm4, %v5540_v37 }
  0x86   :  { %3808 = vmatmul.mubr.msk.bf16.gmra.mrb[24].mxu0 %vm508_vm4, %v5541_v25 }
  0x87   :  { %3811 = vmatprep.mubr.msk.bf16.mxu0 %vm508_vm4, %v5542_v61 }
  0x8e   :  { %3812 = vmatmul.mubr.msk.bf16.gmra.mrb[28].mxu0 %vm508_vm4, %v5544_v34 }
  0x8f   :  { %3817 = vmatprep.mubr.msk.bf16.mxu0 %vm508_vm4, %v3311_v57 }
  0x96   :  { %3818 = vmatmul.mubr.msk.bf16.vlgmr.msra.gmra.mrb[0].mxu0 %vm508_vm4, %v5546_v6 }
  0x97   :  { %3821 = vmatprep.mubr.msk.bf16.mxu0 %vm508_vm4, %v3313_v40  ;;  %3612 = vmatpush3.bf16.msra.mxu0 %v4609_v20  ;;  %v5551_v20 = vcombine.low %v4691_v27, %v4707_v59  ;;  %v4002_v27 = vld [vmem:[%s5502_s3 + $0x10] sm:$0xff]   ;;  %v4004_v59 = vld [vmem:[%s5502_s3 + $0x18] sm:$0xff]  }
  0x98   :  { %3613 = vmatprep.subr.bf16.mxu0 %v3999_v12  ;;  %3907 = vmatpush3.bf16.msra.mxu1 %v4002_v27 }
  0x99   :  { %3900 = vmatprep.subr.bf16.mxu1 %v4003_v48 }
  0x9b   :  { %3614 = vmatpush3.bf16.msra.mxu0 %v4000_v23 }
  0x9c   :  { %3615 = vmatprep.subr.bf16.mxu0 %v4001_v1  ;;  %3908 = vmatpush3.bf16.msra.mxu1 %v4004_v59 }
  0x9d   :  { %3901 = vmatprep.subr.bf16.mxu1 %v4005_v44 }
  0x9e   :  { %3822 = vmatmul.mubr.msk.bf16.gmra.mrb[4].mxu0 %vm508_vm4, %v3314_v31 }
  0x9f   :  { %3825 = vmatprep.mubr.msk.bf16.mxu0 %vm508_vm4, %v5547_v5  ;;  %3616 = vmatpush3.bf16.msra.mxu0 %v4002_v27 }
  0xa0   :  { %3617 = vmatprep.subr.bf16.mxu0 %v4003_v48  ;;  %3909 = vmatpush3.bf16.msra.mxu1 %v4006_v42 }
  0xa1   :  { %3902 = vmatprep.subr.bf16.mxu1 %v4007_v26 }
  0xa3   :  { %3618 = vmatpush3.bf16.msra.mxu0 %v4004_v59 }
  0xa4   :  { %3619 = vmatprep.subr.bf16.mxu0 %v4005_v44  ;;  %3910 = vmatpush3.bf16.msra.mxu1 %v4008_v14 }
  0xa5   :  { %3903 = vmatprep.subr.bf16.mxu1 %v4009_v0 }
  0xa6   :  { %3826 = vmatmul.mubr.msk.bf16.gmra.mrb[8].mxu0 %vm508_vm4, %v5548_v10 }
  0xa7   :  { %3829 = vmatprep.mubr.msk.bf16.mxu0 %vm508_vm4, %v5549_v13  ;;  %3620 = vmatpush3.bf16.msra.mxu0 %v4006_v42 }
  0xa8   :  { %3621 = vmatprep.subr.bf16.mxu0 %v4007_v26  ;;  %3911 = vmatpush3.bf16.msra.mxu1 %v4010_v11 }
  0xa9   :  { %3904 = vmatprep.subr.bf16.mxu1 %v4011_v15 }
  0xab   :  { %3622 = vmatpush3.bf16.msra.mxu0 %v4008_v14 }
  0xac   :  { %3623 = vmatprep.subr.bf16.mxu0 %v4009_v0  ;;  %3912 = vmatpush3.bf16.msra.mxu1 %v4012_v4 }
  0xae   :  { %3830 = vmatmul.mubr.msk.bf16.gmra.mrb[12].mxu0 %vm508_vm4, %v5550_v41 }
  0xaf   :  { %3833 = vmatprep.mubr.msk.bf16.mxu0 %vm508_vm4, %v5551_v20  ;;  %3624 = vmatpush3.bf16.msra.mxu0 %v4010_v11 }
  0xb0   :  { %3625 = vmatprep.subr.bf16.mxu0 %v4011_v15 }
  0xb3   :  { %3626 = vmatpush3.bf16.msra.mxu0 %v4012_v4 }
  0xb6   :  { %3834 = vmatmul.mubr.msk.bf16.gmra.mrb[16].mxu0 %vm508_vm4, %v5552_v3 }
  0xb7   :  { %3837 = vmatprep.mubr.msk.bf16.mxu0 %vm508_vm4, %v5553_v18 }
  0xbe   :  { %3838 = vmatmul.mubr.msk.bf16.gmra.mrb[20].mxu0 %vm508_vm4, %v5554_v50 }
  0xbf   :  { %3841 = vmatprep.mubr.msk.bf16.mxu0 %vm508_vm4, %v5555_v29 }
  0xc6   :  { %3842 = vmatmul.mubr.msk.bf16.gmra.mrb[24].mxu0 %vm508_vm4, %v3324_v16  ;;  %v4967_v16 = vld [vmem:[%s5502_s3 + $0x80] sm:$0xff]  }
  0xc7   :  { %3845 = vmatprep.mubr.msk.bf16.mxu0 %vm508_vm4, %v3325_v45  ;;  %3849 = vmatprep.subr.bf16.mxu1 %v4967_v16  ;;  %v4973_v45 = vld [vmem:[%s5501_s2] ss:$0 sm:$0xff] }
  0xce   :  { %3846 = vmatmul.mubr.msk.bf16.gmra.mrb[28].mxu0 %vm508_vm4, %v3326_v36 }
 0x169   :  { %v3819_v36 = vpop.f32.mrb[0].mxu0 }
 0x16a   :  { %v1483_v43 = vadd.f32 %v3819_v36, %v4973_v45  ;;  %v1315_v58 = vpop.f32.mrb[1].mxu0 }
 0x16b   :  { %v1481_v63 = vadd.f32 %v4973_v45, %v1315_v58  ;;  %v3820_v30 = vpop.f32.mrb[2].mxu0 }
 0x16c   :  { %v1515_v37 = vmax.f32 %v1483_v43, 0.0  ;;  %v1484_v56 = vadd.f32 %v3820_v30, %v4973_v45  ;;  %v1318_v62 = vpop.f32.mrb[3].mxu0 }
 0x16d   :  { %v1513_v17 = vmax.f32 %v1481_v63, 0.0  ;;  %v1482_v33 = vadd.f32 %v4973_v45, %v1318_v62 }
 0x16e   :  { %v1580_v51 = vrot.slane %v1515_v37, 7  ;;  %v1516_v2 = vmax.f32 %v1484_v56, 0.0 }
 0x16f   :  { %v1577_v24 = vrot.slane %v1513_v17, 7  ;;  %v1514_v25 = vmax.f32 %v1482_v33, 0.0 }
 0x170   :  { %v1674_v61 = vsel %vm557_vm0, 0.0, %v1580_v51  ;;  %v1581_v7 = vrot.slane %v1516_v2, 7 }
 0x171   :  { %v3468_v35 = vpack.c.bf16 %v1674_v61, %v1674_v61  ;;  %v1578_v54 = vrot.slane %v1514_v25, 7  ;;  %v3823_v21 = vpop.f32.mrb[4].mxu0  ;;  %v1673_v52 = vsel %vm557_vm0, 0.0, %v1577_v24 }
 0x172   :  { %v1582_v57 = vsel %vm557_vm0, %v1580_v51, %v1581_v7  ;;  %v1690_v49 = vsel %vm557_vm0, %v1581_v7, 0.0  ;;  %v1487_v8 = vadd.f32 %v3823_v21, %v4973_v45  ;;  %v1331_v60 = vpop.f32.mrb[5].mxu0 }
 0x173   :  { %1916 = vst [vmem:[#allocation2 + $0xc] sm:$0xf] %v3468_v35  ;;  %v3469_v28 = vpack.c.bf16 %v1582_v57, %v1582_v57  ;;  %v3470_v34 = vpack.c.bf16 %v1690_v49, %v1690_v49  ;;  %v1579_v19 = vsel %vm557_vm0, %v1577_v24, %v1578_v54  ;;  %v1689_v32 = vsel %vm557_vm0, %v1578_v54, 0.0  ;;  %v3824_v46 = vpop.f32.mrb[6].mxu0 }
 0x174   :  { %v3467_v22 = vpack.c.bf16 %v1689_v32, %v1689_v32  ;;  %v3516_v40 = vpack.c.bf16 %v1579_v19, %v1673_v52  ;;  %v1519_v9 = vmax.f32 %v1487_v8, 0.0  ;;  %v1485_v47 = vadd.f32 %v4973_v45, %v1331_v60  ;;  %v1334_v38 = vpop.f32.mrb[7].mxu0 }
 0x175   :  { %1917 = vst [vmem:[#allocation2 + $0x10] sm:$0xf] %v3469_v28  ;;  %1918 = vst [vmem:[#allocation2 + $0x14] sm:$0x1] %v3470_v34  ;;  %v1488_v39 = vadd.f32 %v3824_v46, %v4973_v45  ;;  %v1486_v6 = vadd.f32 %v4973_v45, %v1334_v38 }
 0x176   :  { %3517 = vst [vmem:[#allocation2] sm:$0xff] %v3516_v40   ;;  %1915 = vst [vmem:[#allocation2 + $0x8] sm:$0x1] %v3467_v22  ;;  %v1586_v53 = vrot.slane %v1519_v9, 7  ;;  %v1517_v55 = vmax.f32 %v1485_v47, 0.0 }
 0x177   :  { %v1520_v31 = vmax.f32 %v1488_v39, 0.0  ;;  %v1518_v5 = vmax.f32 %v1486_v6, 0.0 }
 0x178   :  { %v1676_v10 = vsel %vm557_vm0, 0.0, %v1586_v53  ;;  %v1583_v13 = vrot.slane %v1517_v55, 7 }
 0x179   :  { %v3474_v41 = vpack.c.bf16 %v1676_v10, %v1676_v10  ;;  %v1587_v20 = vrot.slane %v1520_v31, 7  ;;  %v1584_v3 = vrot.slane %v1518_v5, 7  ;;  %v3827_v18 = vpop.f32.mrb[8].mxu0 }
 0x17a   :  { %v1675_v50 = vsel %vm557_vm0, 0.0, %v1583_v13  ;;  %v1491_v29 = vadd.f32 %v3827_v18, %v4973_v45  ;;  %v1347_v12 = vpop.f32.mrb[9].mxu0  ;;  %v1963_v58 = vld [vmem:[#allocation2 + $0xc] sm:$0xf] }
 0x17b   :  { %1922 = vst [vmem:[#allocation2 + $0x24] sm:$0xf] %v3474_v41  ;;  %v1588_v23 = vsel %vm557_vm0, %v1586_v53, %v1587_v20  ;;  %v1692_v1 = vsel %vm557_vm0, %v1587_v20, 0.0  ;;  %v1585_v27 = vsel %vm557_vm0, %v1583_v13, %v1584_v3  ;;  %v1691_v48 = vsel %vm557_vm0, %v1584_v3, 0.0  ;;  %v3828_v59 = vpop.f32.mrb[10].mxu0 }
 0x17c   :  { %v3475_v44 = vpack.c.bf16 %v1588_v23, %v1588_v23  ;;  %v3476_v42 = vpack.c.bf16 %v1692_v1, %v1692_v1  ;;  %v3473_v26 = vpack.c.bf16 %v1691_v48, %v1691_v48  ;;  %v3521_v14 = vpack.c.bf16 %v1585_v27, %v1675_v50  ;;  %v1350_v0 = vpop.f32.mrb[11].mxu0  ;;  %v4996_v11 = vld [vmem:[#allocation2 + $0x10] sm:$0xf]  ;;  %v5001_v63 = vld [vmem:[#allocation2 + $0x14] ss:$0 sps:$4 sm:$0x11]  }
 0x17d   :  { %v1523_v15 = vmax.f32 %v1491_v29, 0.0  ;;  %v1489_v4 = vadd.f32 %v4973_v45, %v1347_v12  ;;  %v1492_v36 = vadd.f32 %v3828_v59, %v4973_v45  ;;  %v1490_v43 = vadd.f32 %v4973_v45, %v1350_v0  ;;  %v1961_v54 = vld [vmem:[#allocation2] sm:$0xf]  ;;  %v5011_v60 = vld [vmem:[#allocation2 + $0x8] ss:$0 sps:$4 sm:$0x11]  }
 0x17e   :  { %1923 = vst [vmem:[#allocation2 + $0x28] sm:$0xf] %v3475_v44  ;;  %1924 = vst [vmem:[#allocation2 + $0x2c] sm:$0x1] %v3476_v42  ;;  %v5004_v30 = vcombine.low %v1963_v58, %v4996_v11  ;;  %v2190_v2 = vshll.u32 %v5001_v63, 16  ;;  %v2178_v3 = vshll.u32 %v5011_v60, 16 }
 0x17f   :  { %3553 = vst [vmem:[#allocation2 + $0x18] sm:$0xff] %v3521_v14   ;;  %1921 = vst [vmem:[#allocation2 + $0x20] sm:$0x1] %v3473_v26  ;;  %v1592_v37 = vrot.slane %v1523_v15, 7  ;;  %v1521_v56 = vmax.f32 %v1489_v4, 0.0  ;;  %v1524_v62 = vmax.f32 %v1492_v36, 0.0 }
 0x180   :  { %v1522_v17 = vmax.f32 %v1490_v43, 0.0  ;;  %v2183_v33 = vshrl.u32 %v5004_v30, 16  ;;  %v2185_v51 = vshll.u32 %v5004_v30, 16  ;;  %v2192_v8 = vrot.slane %v2190_v2, 1  ;;  %v5017_v22 = vld [vmem:[#allocation2 + $0x4] sm:$0xf] }
 0x181   :  { %v1678_v24 = vsel %vm557_vm0, 0.0, %v1592_v37  ;;  %v1589_v25 = vrot.slane %v1521_v56, 7  ;;  %v1593_v61 = vrot.slane %v1524_v62, 7  ;;  %v3831_v35 = vpop.f32.mrb[12].mxu0  ;;  %v5026_v20 = vcombine.low %v1961_v54, %v5017_v22  ;;  %v4022_v59 = vld [vmem:[%s5502_s3 + $0x88] sm:$0xff]  }
 0x182   :  { %v1590_v7 = vrot.slane %v1522_v17, 7  ;;  %v3480_v21 = vpack.c.bf16 %v1678_v24, %v1678_v24  ;;  %v1495_v52 = vadd.f32 %v3831_v35, %v4973_v45  ;;  %v1363_v57 = vpop.f32.mrb[13].mxu0  ;;  %v2187_v49 = vrot.slane %v2185_v51, 1 }
 0x183   :  { %v1677_v28 = vsel %vm557_vm0, 0.0, %v1589_v25  ;;  %v1594_v34 = vsel %vm557_vm0, %v1592_v37, %v1593_v61  ;;  %v1694_v19 = vsel %vm557_vm0, %v1593_v61, 0.0  ;;  %v3832_v46 = vpop.f32.mrb[14].mxu0  ;;  %v1493_v55 = vadd.f32 %v4973_v45, %v1363_v57 }
 0x184   :  { %v1591_v32 = vsel %vm557_vm0, %v1589_v25, %v1590_v7  ;;  %1928 = vst [vmem:[#allocation2 + $0x3c] sm:$0xf] %v3480_v21  ;;  %v3481_v40 = vpack.c.bf16 %v1594_v34, %v1594_v34  ;;  %v3482_v9 = vpack.c.bf16 %v1694_v19, %v1694_v19  ;;  %v1693_v47 = vsel %vm557_vm0, %v1590_v7, 0.0  ;;  %v1366_v39 = vpop.f32.mrb[15].mxu0  ;;  %v4027_v7 = vld [vmem:[%s5502_s3 + $0x90] sm:$0xff]  }
 0x185   :  { %v3526_v38 = vpack.c.bf16 %v1591_v32, %v1677_v28  ;;  %v3479_v6 = vpack.c.bf16 %v1693_v47, %v1693_v47  ;;  %v1527_v53 = vmax.f32 %v1495_v52, 0.0  ;;  %v1496_v31 = vadd.f32 %v3832_v46, %v4973_v45  ;;  %v5053_v52 = vld [vmem:[#allocation2 + $0x28] sm:$0xf]  ;;  %v5055_v57 = vld [vmem:[#allocation2 + $0x2c] ss:$0 sps:$4 sm:$0x11]  }
 0x186   :  { %v1965_v5 = vld [vmem:[#allocation2 + $0x18] sm:$0xf]  ;;  %v5022_v10 = vld [vmem:[#allocation2 + $0x1c] sm:$0xf]  ;;  %1929 = vst [vmem:[#allocation2 + $0x40] sm:$0xf] %v3481_v40  ;;  %v1494_v13 = vadd.f32 %v4973_v45, %v1366_v39  ;;  %v2188_v41 = vor.u32 %v2187_v49, %v2183_v33 }
 0x187   :  { %1930 = vst [vmem:[#allocation2 + $0x44] sm:$0x1] %v3482_v9  ;;  %3554 = vst [vmem:[#allocation2 + $0x30] sm:$0xff] %v3526_v38   ;;  %v1598_v18 = vrot.slane %v1527_v53, 7  ;;  %v1525_v50 = vmax.f32 %v1493_v55, 0.0  ;;  %v1528_v29 = vmax.f32 %v1496_v31, 0.0  ;;  %v5030_v12 = vcombine.low %v1965_v5, %v5022_v10 }
 0x188   :  { %1927 = vst [vmem:[#allocation2 + $0x38] sm:$0x1] %v3479_v6  ;;  %v1526_v23 = vmax.f32 %v1494_v13, 0.0  ;;  %v2193_v1 = vsel %vm2169_vm9, %v2188_v41, %v2192_v8  ;;  %v2171_v27 = vshrl.u32 %v5026_v20, 16  ;;  %v2173_v48 = vshll.u32 %v5026_v20, 16  ;;  %v4032_v53 = vld [vmem:[%s5502_s3 + $0x98] sm:$0xff]  }
 0x189   :  { %v1680_v44 = vsel %vm557_vm0, 0.0, %v1598_v18  ;;  %v1595_v42 = vrot.slane %v1525_v50, 7  ;;  %v1599_v26 = vrot.slane %v1528_v29, 7  ;;  %2730 = vmatprep.mubr.bf16.mxu1 %v2193_v1  ;;  %v2180_v14 = vrot.slane %v2178_v3, 1  ;;  %v3835_v0 = vpop.f32.mrb[16].mxu0 }
 0x18a   :  { %v3486_v15 = vpack.c.bf16 %v1680_v44, %v1680_v44  ;;  %v1596_v4 = vrot.slane %v1526_v23, 7  ;;  %v2175_v36 = vrot.slane %v2173_v48, 1  ;;  %2731 = vmatmul.mubr.bf16.vlgmr.msra.gmra.mrb[0].mxu1 %v5004_v30  ;;  %v1499_v43 = vadd.f32 %v3835_v0, %v4973_v45  ;;  %v1379_v58 = vpop.f32.mrb[17].mxu0  ;;  %v5046_v51 = vld [vmem:[#allocation2 + $0x20] ss:$0 sps:$4 sm:$0x11]  }
 0x18b   :  { %v1679_v37 = vsel %vm557_vm0, 0.0, %v1595_v42  ;;  %v1600_v56 = vsel %vm557_vm0, %v1598_v18, %v1599_v26  ;;  %v1696_v62 = vsel %vm557_vm0, %v1599_v26, 0.0  ;;  %3850 = vmatpush3.bf16.msra.mxu1 %v4967_v16  ;;  %v1497_v17 = vadd.f32 %v4973_v45, %v1379_v58  ;;  %v3836_v33 = vpop.f32.mrb[18].mxu0  ;;  %v1967_v9 = vld [vmem:[#allocation2 + $0x24] sm:$0xf] }
 0x18c   :  { %1934 = vst [vmem:[#allocation2 + $0x54] sm:$0xf] %v3486_v15  ;;  %v3487_v2 = vpack.c.bf16 %v1600_v56, %v1600_v56  ;;  %v3488_v24 = vpack.c.bf16 %v1696_v62, %v1696_v62  ;;  %v1597_v30 = vsel %vm557_vm0, %v1595_v42, %v1596_v4  ;;  %v1695_v25 = vsel %vm557_vm0, %v1596_v4, 0.0  ;;  %v1382_v61 = vpop.f32.mrb[19].mxu0  ;;  %3851 = vmatprep.subr.bf16.mxu1 %v4022_v59 }
 0x18d   :  { %v3485_v35 = vpack.c.bf16 %v1695_v25, %v1695_v25  ;;  %v3531_v16 = vpack.c.bf16 %v1597_v30, %v1679_v37  ;;  %v2176_v54 = vor.u32 %v2175_v36, %v2171_v27  ;;  %v1531_v21 = vmax.f32 %v1499_v43, 0.0  ;;  %v5084_v62 = vld [vmem:[#allocation2 + $0x40] sm:$0xf] }
 0x18e   :  { %1935 = vst [vmem:[#allocation2 + $0x58] sm:$0xf] %v3487_v2  ;;  %1936 = vst [vmem:[#allocation2 + $0x5c] sm:$0x1] %v3488_v24  ;;  %v1529_v49 = vmax.f32 %v1497_v17, 0.0  ;;  %v1500_v8 = vadd.f32 %v3836_v33, %v4973_v45  ;;  %v1498_v28 = vadd.f32 %v4973_v45, %v1382_v61  ;;  %v2195_v34 = vshrl.u32 %v5030_v12, 16 }
 0x18f   :  { %3555 = vst [vmem:[#allocation2 + $0x48] sm:$0xff] %v3531_v16   ;;  %1933 = vst [vmem:[#allocation2 + $0x50] sm:$0x1] %v3485_v35  ;;  %v2181_v19 = vsel %vm2169_vm9, %v2176_v54, %v2180_v14  ;;  %v1604_v32 = vrot.slane %v1531_v21, 7  ;;  %v2197_v46 = vshll.u32 %v5030_v12, 16  ;;  %v2202_v40 = vshll.u32 %v5046_v51, 16  ;;  %3852 = vmatpush3.bf16.msra.mxu1 %v4022_v59 }
 0x190   :  { %2722 = vmatprep.mubr.bf16.mxu0 %v2181_v19  ;;  %v1601_v47 = vrot.slane %v1529_v49, 7  ;;  %v1532_v38 = vmax.f32 %v1500_v8, 0.0  ;;  %v1530_v39 = vmax.f32 %v1498_v28, 0.0  ;;  %v5064_v6 = vcombine.low %v1967_v9, %v5053_v52  ;;  %3853 = vmatprep.subr.bf16.mxu1 %v4027_v7  ;;  %v1969_v1 = vld [vmem:[#allocation2 + $0x30] sm:$0xf]  ;;  %v4037_v30 = vld [vmem:[%s5502_s3 + $0xa0] sm:$0xff]  }
 0x191   :  { %2723 = vmatmul.mubr.bf16.vlgmr.msra.gmra.mrb[32].mxu0 %v5026_v20  ;;  %v1682_v55 = vsel %vm557_vm0, 0.0, %v1604_v32  ;;  %v2199_v31 = vrot.slane %v2197_v46, 1  ;;  %v2204_v5 = vrot.slane %v2202_v40, 1  ;;  %v3839_v13 = vpop.f32.mrb[20].mxu0  ;;  %v2214_v41 = vshll.u32 %v5055_v57, 16 }
 0x192   :  { %v3492_v3 = vpack.c.bf16 %v1682_v55, %v1682_v55  ;;  %v1681_v18 = vsel %vm557_vm0, 0.0, %v1601_v47  ;;  %v1605_v50 = vrot.slane %v1532_v38, 7  ;;  %v1602_v29 = vrot.slane %v1530_v39, 7  ;;  %v1395_v23 = vpop.f32.mrb[21].mxu0  ;;  %v5076_v42 = vld [vmem:[#allocation2 + $0x34] sm:$0xf] }
 0x193   :  { %v2200_v27 = vor.u32 %v2199_v31, %v2195_v34  ;;  %v1503_v48 = vadd.f32 %v3839_v13, %v4973_v45  ;;  %v2207_v59 = vshrl.u32 %v5064_v6, 16  ;;  %v2209_v20 = vshll.u32 %v5064_v6, 16  ;;  %v3840_v44 = vpop.f32.mrb[22].mxu0  ;;  %3854 = vmatpush3.bf16.msra.mxu1 %v4027_v7  ;;  %v5082_v36 = vld [vmem:[#allocation2 + $0x38] ss:$0 sps:$4 sm:$0x11]  }
 0x194   :  { %1940 = vst [vmem:[#allocation2 + $0x6c] sm:$0xf] %v3492_v3  ;;  %v1606_v26 = vsel %vm557_vm0, %v1604_v32, %v1605_v50  ;;  %v1698_v14 = vsel %vm557_vm0, %v1605_v50, 0.0  ;;  %v1603_v0 = vsel %vm557_vm0, %v1601_v47, %v1602_v29  ;;  %v1697_v15 = vsel %vm557_vm0, %v1602_v29, 0.0  ;;  %v1398_v4 = vpop.f32.mrb[23].mxu0  ;;  %3855 = vmatprep.subr.bf16.mxu1 %v4032_v53  ;;  %v4042_v39 = vld [vmem:[%s5502_s3 + $0xa8] sm:$0xff]  }
 0x195   :  { %v3493_v43 = vpack.c.bf16 %v1606_v26, %v1606_v26  ;;  %v3494_v58 = vpack.c.bf16 %v1698_v14, %v1698_v14  ;;  %v3491_v37 = vpack.c.bf16 %v1697_v15, %v1697_v15  ;;  %v3536_v56 = vpack.c.bf16 %v1603_v0, %v1681_v18  ;;  %v1971_v16 = vld [vmem:[#allocation2 + $0x3c] sm:$0xf]  ;;  %v4047_v0 = vld [vmem:[%s5502_s3 + $0xb0] sm:$0xff]  }
 0x196   :  { %v2205_v17 = vsel %vm2169_vm9, %v2200_v27, %v2204_v5  ;;  %v1535_v33 = vmax.f32 %v1503_v48, 0.0  ;;  %v2211_v2 = vrot.slane %v2209_v20, 1  ;;  %v2216_v24 = vrot.slane %v2214_v41, 1 }
 0x197   :  { %1941 = vst [vmem:[#allocation2 + $0x70] sm:$0xf] %v3493_v43  ;;  %1942 = vst [vmem:[#allocation2 + $0x74] sm:$0x1] %v3494_v58  ;;  %2738 = vmatprep.mubr.bf16.mxu1 %v2205_v17  ;;  %v1501_v25 = vadd.f32 %v4973_v45, %v1395_v23  ;;  %v1504_v61 = vadd.f32 %v3840_v44, %v4973_v45  ;;  %v1502_v7 = vadd.f32 %v4973_v45, %v1398_v4 }
 0x198   :  { %3556 = vst [vmem:[#allocation2 + $0x60] sm:$0xff] %v3536_v56   ;;  %1939 = vst [vmem:[#allocation2 + $0x68] sm:$0x1] %v3491_v37  ;;  %v5094_v35 = vcombine.low %v1969_v1, %v5076_v42  ;;  %2739 = vmatmul.mubr.bf16.gmra.mrb[4].mxu1 %v5030_v12  ;;  %v1610_v54 = vrot.slane %v1535_v33, 7  ;;  %v2212_v21 = vor.u32 %v2211_v2, %v2207_v59  ;;  %v2226_v49 = vshll.u32 %v5082_v36, 16 }
 0x199   :  { %v5099_v8 = vcombine.low %v1971_v16, %v5084_v62  ;;  %v1533_v28 = vmax.f32 %v1501_v25, 0.0  ;;  %v1536_v34 = vmax.f32 %v1504_v61, 0.0  ;;  %v1534_v19 = vmax.f32 %v1502_v7, 0.0  ;;  %v3843_v32 = vpop.f32.mrb[24].mxu0  ;;  %3856 = vmatpush3.bf16.msra.mxu1 %v4032_v53  ;;  %v1973_v2 = vld [vmem:[#allocation2 + $0x48] sm:$0xf] }
 0x19a   :  { %v2219_v46 = vshrl.u32 %v5094_v35, 16  ;;  %v1684_v40 = vsel %vm557_vm0, 0.0, %v1610_v54  ;;  %v2217_v9 = vsel %vm2169_vm9, %v2212_v21, %v2216_v24  ;;  %v1507_v12 = vadd.f32 %v3843_v32, %v4973_v45  ;;  %v1411_v38 = vpop.f32.mrb[25].mxu0  ;;  %3857 = vmatprep.subr.bf16.mxu1 %v4037_v30  ;;  %v5114_v59 = vld [vmem:[#allocation2 + $0x44] ss:$0 sps:$4 sm:$0x11]  }
 0x19b   :  { %v2221_v47 = vshll.u32 %v5094_v35, 16  ;;  %v3498_v55 = vpack.c.bf16 %v1684_v40, %v1684_v40  ;;  %2746 = vmatprep.mubr.bf16.mxu1 %v2217_v9  ;;  %v1607_v31 = vrot.slane %v1533_v28, 7  ;;  %v1611_v5 = vrot.slane %v1536_v34, 7  ;;  %v3844_v53 = vpop.f32.mrb[26].mxu0  ;;  %v5129_v28 = vld [vmem:[#allocation2 + $0x4c] sm:$0xf] }
 0x19c   :  { %v1608_v13 = vrot.slane %v1534_v19, 7  ;;  %v1539_v41 = vmax.f32 %v1507_v12, 0.0  ;;  %v2228_v18 = vrot.slane %v2226_v49, 1  ;;  %v1505_v50 = vadd.f32 %v4973_v45, %v1411_v38  ;;  %v1414_v29 = vpop.f32.mrb[27].mxu0  ;;  %v4050_v34 = vld [vmem:[%s5502_s3 + $0xb8] sm:$0xff]  }
 0x19d   :  { %v2223_v3 = vrot.slane %v2221_v47, 1  ;;  %1946 = vst [vmem:[#allocation2 + $0x84] sm:$0xf] %v3498_v55  ;;  %v1683_v23 = vsel %vm557_vm0, 0.0, %v1607_v31  ;;  %v1612_v1 = vsel %vm557_vm0, %v1610_v54, %v1611_v5  ;;  %v1700_v27 = vsel %vm557_vm0, %v1611_v5, 0.0  ;;  %3858 = vmatpush3.bf16.msra.mxu1 %v4037_v30 }
 0x19e   :  { %v1609_v48 = vsel %vm557_vm0, %v1607_v31, %v1608_v13  ;;  %v3499_v20 = vpack.c.bf16 %v1612_v1, %v1612_v1  ;;  %v3500_v44 = vpack.c.bf16 %v1700_v27, %v1700_v27  ;;  %v1699_v26 = vsel %vm557_vm0, %v1608_v13, 0.0  ;;  %3859 = vmatprep.subr.bf16.mxu1 %v4042_v39 }
 0x19f   :  { %v3541_v14 = vpack.c.bf16 %v1609_v48, %v1683_v23  ;;  %v3497_v15 = vpack.c.bf16 %v1699_v26, %v1699_v26  ;;  %v1616_v4 = vrot.slane %v1539_v41, 7  ;;  %v2224_v43 = vor.u32 %v2223_v3, %v2219_v46 }
 0x1a0   :  { %v1537_v58 = vmax.f32 %v1505_v50, 0.0  ;;  %1947 = vst [vmem:[#allocation2 + $0x88] sm:$0xf] %v3499_v20  ;;  %1948 = vst [vmem:[#allocation2 + $0x8c] sm:$0x1] %v3500_v44  ;;  %2747 = vmatmul.mubr.bf16.gmra.mrb[8].mxu1 %v5064_v6  ;;  %v1508_v37 = vadd.f32 %v3844_v53, %v4973_v45  ;;  %v1506_v56 = vadd.f32 %v4973_v45, %v1414_v29  ;;  %v2231_v17 = vshrl.u32 %v5099_v8, 16 }
 0x1a1   :  { %3557 = vst [vmem:[#allocation2 + $0x78] sm:$0xff] %v3541_v14   ;;  %v2233_v33 = vshll.u32 %v5099_v8, 16  ;;  %1945 = vst [vmem:[#allocation2 + $0x80] sm:$0x1] %v3497_v15  ;;  %v1686_v24 = vsel %vm557_vm0, 0.0, %v1616_v4  ;;  %v2229_v30 = vsel %vm2169_vm9, %v2224_v43, %v2228_v18  ;;  %v3847_v61 = vpop.f32.mrb[28].mxu0  ;;  %3860 = vmatpush3.bf16.msra.mxu1 %v4042_v39  ;;  %v5139_v53 = vcombine.low %v1973_v2, %v5129_v28 }
 0x1a2   :  { %v1613_v25 = vrot.slane %v1537_v58, 7  ;;  %v2238_v7 = vshll.u32 %v5114_v59, 16  ;;  %v3504_v6 = vpack.c.bf16 %v1686_v24, %v1686_v24  ;;  %2754 = vmatprep.mubr.bf16.mxu1 %v2229_v30  ;;  %v1540_v16 = vmax.f32 %v1508_v37, 0.0  ;;  %v1427_v49 = vpop.f32.mrb[29].mxu0  ;;  %3861 = vmatprep.subr.bf16.mxu1 %v4047_v0 }
 0x1a3   :  { %v1538_v54 = vmax.f32 %v1506_v56, 0.0  ;;  %v1511_v21 = vadd.f32 %v3847_v61, %v4973_v45  ;;  %v2235_v32 = vrot.slane %v2233_v33, 1  ;;  %v1509_v40 = vadd.f32 %v4973_v45, %v1427_v49  ;;  %v3848_v9 = vpop.f32.mrb[30].mxu0  ;;  %v5145_v29 = vld [vmem:[#allocation2 + $0x50] ss:$0 sps:$4 sm:$0x11]  }
 0x1a4   :  { %v1685_v19 = vsel %vm557_vm0, 0.0, %v1613_v25  ;;  %v2240_v46 = vrot.slane %v2238_v7, 1  ;;  %1952 = vst [vmem:[#allocation2 + $0x9c] sm:$0xf] %v3504_v6  ;;  %v1617_v12 = vrot.slane %v1540_v16, 7  ;;  %v1512_v39 = vadd.f32 %v3848_v9, %v4973_v45  ;;  %v1430_v55 = vpop.f32.mrb[31].mxu0 }
 0x1a5   :  { %v1614_v47 = vrot.slane %v1538_v54, 7  ;;  %v1543_v38 = vmax.f32 %v1511_v21, 0.0  ;;  %v2236_v31 = vor.u32 %v2235_v32, %v2231_v17  ;;  %v1541_v5 = vmax.f32 %v1509_v40, 0.0  ;;  %3862 = vmatpush3.bf16.msra.mxu1 %v4047_v0  ;;  %v1977_v21 = vld [vmem:[#allocation2 + $0x60] sm:$0xf] }
 0x1a6   :  { %v1510_v13 = vadd.f32 %v4973_v45, %v1430_v55  ;;  %v1618_v41 = vsel %vm557_vm0, %v1616_v4, %v1617_v12  ;;  %v1702_v3 = vsel %vm557_vm0, %v1617_v12, 0.0  ;;  %3863 = vmatprep.subr.bf16.mxu1 %v4050_v34  ;;  %v5147_v45 = vld [vmem:[#allocation2 + $0x58] sm:$0xf]  ;;  %v1544_v14 = vmax.f32 %v1512_v39, 0.0  ;;  %v1975_v4 = vld [vmem:[#allocation2 + $0x54] sm:$0xf] }
 0x1a7   :  { %v1615_v18 = vsel %vm557_vm0, %v1613_v25, %v1614_v47  ;;  %v1701_v50 = vsel %vm557_vm0, %v1614_v47, 0.0  ;;  %v3505_v23 = vpack.c.bf16 %v1618_v41, %v1618_v41  ;;  %v3506_v1 = vpack.c.bf16 %v1702_v3, %v1702_v3  ;;  %v5164_v49 = vld [vmem:[#allocation2 + $0x64] sm:$0xf]  ;;  %v5166_v40 = vld [vmem:[#allocation2 + $0x5c] ss:$0 sps:$4 sm:$0x11]  }
 0x1a8   :  { %v3503_v27 = vpack.c.bf16 %v1701_v50, %v1701_v50  ;;  %v3546_v48 = vpack.c.bf16 %v1615_v18, %v1685_v19  ;;  %2755 = vmatmul.mubr.bf16.gmra.mrb[12].mxu1 %v5094_v35  ;;  %v1622_v20 = vrot.slane %v1543_v38, 7  ;;  %v2241_v44 = vsel %vm2169_vm9, %v2236_v31, %v2240_v46  ;;  %v5173_v38 = vld [vmem:[#allocation2 + $0x70] sm:$0xf]  ;;  %v1979_v39 = vld [vmem:[#allocation2 + $0x6c] sm:$0xf] }
 0x1a9   :  { %v1619_v26 = vrot.slane %v1541_v5, 7  ;;  %1953 = vst [vmem:[#allocation2 + $0xa0] sm:$0xf] %v3505_v23  ;;  %1954 = vst [vmem:[#allocation2 + $0xa4] sm:$0x1] %v3506_v1  ;;  %2762 = vmatprep.mubr.bf16.mxu1 %v2241_v44  ;;  %v1542_v0 = vmax.f32 %v1510_v13, 0.0  ;;  %3864 = vmatpush3.bf16.msra.mxu1 %v4050_v34  ;;  %v5155_v37 = vcombine.low %v1975_v4, %v5147_v45 }
 0x1aa   :  { %3558 = vst [vmem:[#allocation2 + $0x90] sm:$0xff] %v3546_v48   ;;  %1951 = vst [vmem:[#allocation2 + $0x98] sm:$0x1] %v3503_v27  ;;  %v2245_v15 = vshll.u32 %v5139_v53, 16  ;;  %v1688_v43 = vsel %vm557_vm0, 0.0, %v1622_v20  ;;  %v1623_v58 = vrot.slane %v1544_v14, 7  ;;  %v5171_v47 = vcombine.low %v1977_v21, %v5164_v49 }
 0x1ab   :  { %v2250_v35 = vshll.u32 %v5145_v29, 16  ;;  %v3510_v56 = vpack.c.bf16 %v1688_v43, %v1688_v43  ;;  %v1620_v17 = vrot.slane %v1542_v0, 7  ;;  %v2243_v33 = vshrl.u32 %v5139_v53, 16  ;;  %v1981_v5 = vld [vmem:[#allocation2 + $0x78] sm:$0xf] }
 0x1ac   :  { %v2247_v2 = vrot.slane %v2245_v15, 1  ;;  %v1687_v24 = vsel %vm557_vm0, 0.0, %v1619_v26  ;;  %v1624_v30 = vsel %vm557_vm0, %v1622_v20, %v1623_v58  ;;  %v1704_v25 = vsel %vm557_vm0, %v1623_v58, 0.0  ;;  %v5177_v13 = vld [vmem:[#allocation2 + $0x7c] sm:$0xf] }
 0x1ad   :  { %v2257_v61 = vshll.u32 %v5155_v37, 16  ;;  %1958 = vst [vmem:[#allocation2 + $0xb4] sm:$0xf] %v3510_v56  ;;  %v3511_v7 = vpack.c.bf16 %v1624_v30, %v1624_v30  ;;  %v3512_v6 = vpack.c.bf16 %v1704_v25, %v1704_v25  ;;  %v1621_v16 = vsel %vm557_vm0, %v1619_v26, %v1620_v17  ;;  %v5183_v18 = vld [vmem:[#allocation2 + $0x68] ss:$0 sps:$4 sm:$0x11]  }
 0x1ae   :  { %v1703_v54 = vsel %vm557_vm0, %v1620_v17, 0.0  ;;  %v3551_v19 = vpack.c.bf16 %v1621_v16, %v1687_v24  ;;  %v2248_v32 = vor.u32 %v2247_v2, %v2243_v33  ;;  %v2252_v46 = vrot.slane %v2250_v35, 1  ;;  %v5188_v1 = vld [vmem:[#allocation2 + $0x74] ss:$0 sps:$4 sm:$0x11]  }
 0x1af   :  { %v3509_v34 = vpack.c.bf16 %v1703_v54, %v1703_v54  ;;  %1959 = vst [vmem:[#allocation2 + $0xb8] sm:$0xf] %v3511_v7  ;;  %1960 = vst [vmem:[#allocation2 + $0xbc] sm:$0x1] %v3512_v6  ;;  %v2259_v12 = vrot.slane %v2257_v61, 1  ;;  %v2255_v55 = vshrl.u32 %v5155_v37, 16  ;;  %v5180_v41 = vcombine.low %v1979_v39, %v5173_v38 }
 0x1b0   :  { %3559 = vst [vmem:[#allocation2 + $0xa8] sm:$0xff] %v3551_v19   ;;  %2763 = vmatmul.mubr.bf16.gmra.mrb[16].mxu1 %v5099_v8  ;;  %v2253_v9 = vsel %vm2169_vm9, %v2248_v32, %v2252_v46  ;;  %v2262_v31 = vshll.u32 %v5166_v40, 16  ;;  %v2269_v3 = vshll.u32 %v5171_v47, 16  ;;  %v5186_v50 = vcombine.low %v1981_v5, %v5177_v13  ;;  %v2010_v26 = vld [vmem:[#allocation2 + $0xc] sm:$0xe] }
 0x1b1   :  { %1957 = vst [vmem:[#allocation2 + $0xb0] sm:$0x1] %v3509_v34  ;;  %2770 = vmatprep.mubr.bf16.mxu1 %v2253_v9  ;;  %v2260_v8 = vor.u32 %v2259_v12, %v2255_v55  ;;  %v2281_v27 = vshll.u32 %v5180_v41, 16  ;;  %v2267_v14 = vshrl.u32 %v5171_v47, 16  ;;  %v2274_v0 = vshll.u32 %v5183_v18, 16 }
 0x1b2   :  { %v2264_v23 = vrot.slane %v2262_v31, 1  ;;  %v2271_v20 = vrot.slane %v2269_v3, 1  ;;  %v2293_v44 = vshll.u32 %v5186_v50, 16  ;;  %v2286_v15 = vshll.u32 %v5188_v1, 16  ;;  %v5197_v4 = vld [vmem:[#allocation2 + $0x88] sm:$0xf] }
 0x1b3   :  { %v2283_v43 = vrot.slane %v2281_v27, 1  ;;  %v5199_v58 = vld [vmem:[#allocation2 + $0x80] ss:$0 sps:$4 sm:$0x11]   ;;  %v2009_v35 = vld [vmem:[#allocation2] sm:$0xe] }
 0x1b4   :  { %v2265_v48 = vsel %vm2169_vm9, %v2260_v8, %v2264_v23  ;;  %v2272_v56 = vor.u32 %v2271_v20, %v2267_v14  ;;  %v1983_v17 = vld [vmem:[#allocation2 + $0x84] sm:$0xf]  ;;  %v2431_v33 = vrot.slane %v5001_v63, 1  ;;  %v2279_v2 = vshrl.u32 %v5180_v41, 16  ;;  %v2011_v25 = vld [vmem:[#allocation2 + $0x18] sm:$0xe] }
 0x1b5   :  { %v2295_v24 = vrot.slane %v2293_v44, 1  ;;  %v5205_v30 = vcombine.low %v1983_v17, %v5197_v4  ;;  %v2276_v61 = vrot.slane %v2274_v0, 1  ;;  %v2288_v7 = vrot.slane %v2286_v15, 1  ;;  %v2013_v63 = vld [vmem:[#allocation2 + $0x30] sm:$0xe] }
 0x1b6   :  { %v3424_v6 = vcombine.low %v2009_v35, %v5017_v22  ;;  %v2428_v16 = vrot.slane %v5011_v60, 1  ;;  %v2284_v54 = vor.u32 %v2283_v43, %v2279_v2  ;;  %v2298_v21 = vshll.u32 %v5199_v58, 16  ;;  %v2012_v12 = vld [vmem:[#allocation2 + $0x24] sm:$0xe]  ;;  %v2015_v31 = vld [vmem:[#allocation2 + $0x48] sm:$0xe] }
 0x1b7   :  { %v2277_v19 = vsel %vm2169_vm9, %v2272_v56, %v2276_v61  ;;  %v3426_v46 = vcombine.low %v2011_v25, %v5022_v10  ;;  %v2434_v9 = vrot.slane %v5046_v51, 1  ;;  %v2305_v60 = vshll.u32 %v5205_v30, 16  ;;  %v2014_v8 = vld [vmem:[#allocation2 + $0x3c] sm:$0xe]  ;;  %v2016_v20 = vld [vmem:[#allocation2 + $0x54] sm:$0xe] }
 0x1b8   :  { %2771 = vmatmul.mubr.bf16.gmra.mrb[20].mxu1 %v5139_v53  ;;  %v3425_v53 = vcombine.low %v2010_v26, %v4996_v11  ;;  %v2291_v11 = vshrl.u32 %v5186_v50, 16  ;;  %v2427_v32 = vrot.slane %v3424_v6, 1  ;;  %v3427_v55 = vcombine.low %v2012_v12, %v5053_v52  ;;  %v2017_v44 = vld [vmem:[#allocation2 + $0x60] sm:$0xe]  ;;  %v2018_v0 = vld [vmem:[#allocation2 + $0x6c] sm:$0xe] }
 0x1b9   :  { %2778 = vmatprep.mubr.bf16.mxu1 %v2265_v48  ;;  %v2433_v5 = vrot.slane %v3426_v46, 1  ;;  %v2437_v10 = vrot.slane %v5055_v57, 1  ;;  %v3428_v51 = vcombine.low %v2013_v63, %v5076_v42  ;;  %v2289_v3 = vsel %vm2169_vm9, %v2284_v54, %v2288_v7  ;;  %v5230_v52 = vld [vmem:[#allocation2 + $0x8c] ss:$0 sps:$4 sm:$0x11]  }
 0x1ba   :  { %v2430_v34 = vrot.slane %v3425_v53, 1  ;;  %v5215_v22 = vor.u32 %v2295_v24, %v2291_v11  ;;  %v2436_v23 = vrot.slane %v3427_v55, 1  ;;  %v2440_v27 = vrot.slane %v5082_v36, 1  ;;  %v2019_v15 = vld [vmem:[#allocation2 + $0x78] sm:$0xe] }
 0x1bb   :  { %v3429_v48 = vcombine.low %v2014_v8, %v5084_v62  ;;  %v5233_v26 = vsel %vm2426_vm10, %v2433_v5, %v2434_v9  ;;  %v2439_v14 = vrot.slane %v3428_v51, 1  ;;  %v2443_v57 = vrot.slane %v5114_v59, 1  ;;  %v1986_v43 = vld [vmem:[#allocation2 + $0x94] sm:$0xf]  ;;  %v2020_v24 = vld [vmem:[#allocation2 + $0x84] sm:$0xe] }
 0x1bc   :  { %v5219_v39 = vsel %vm2426_vm10, %v2430_v34, %v2431_v33  ;;  %v3430_v42 = vcombine.low %v2015_v31, %v5129_v28  ;;  %v5237_v35 = vld [vmem:[#allocation2 + $0x98] ss:$0 sps:$4 sm:$0x11]   ;;  %v5240_v36 = vsel %vm2426_vm10, %v2436_v23, %v2437_v10  ;;  %v2446_v53 = vrot.slane %v5145_v29, 1  ;;  %v1988_v25 = vld [vmem:[#allocation2 + $0xa0] sm:$0xf] }
 0x1bd   :  { %v2442_v62 = vrot.slane %v3429_v48, 1  ;;  %v3431_v56 = vcombine.low %v2016_v20, %v5147_v45  ;;  %v5244_v17 = vld [vmem:[#allocation2 + $0xa4] ss:$0 sps:$4 sm:$0x11]   ;;  %v5247_v33 = vsel %vm2426_vm10, %v2439_v14, %v2440_v27  ;;  %v2449_v28 = vrot.slane %v5166_v40, 1 }
 0x1be   :  { %v2445_v59 = vrot.slane %v3430_v42, 1  ;;  %v3432_v2 = vcombine.low %v2017_v44, %v5164_v49  ;;  %v2452_v29 = vrot.slane %v5183_v18, 1  ;;  %v3433_v45 = vcombine.low %v2018_v0, %v5173_v38  ;;  %v2021_v6 = vld [vmem:[#allocation2 + $0x90] sm:$0xe]  ;;  %v5259_v54 = vld [vmem:[#allocation2 + $0xb8] sm:$0xf] }
 0x1bf   :  { %v5252_v61 = vsel %vm2426_vm10, %v2442_v62, %v2443_v57  ;;  %v2448_v7 = vrot.slane %v3431_v56, 1  ;;  %v2455_v11 = vrot.slane %v5188_v1, 1  ;;  %v3434_v34 = vcombine.low %v2019_v15, %v5177_v13  ;;  %v2022_v63 = vld [vmem:[#allocation2 + $0x9c] sm:$0xe]  ;;  %v1990_v18 = vld [vmem:[#allocation2 + $0xac] sm:$0xf] }
 0x1c0   :  { %2779 = vmatmul.mubr.bf16.gmra.mrb[24].mxu1 %v5155_v37  ;;  %v5223_v37 = vsel %vm2426_vm10, %v2427_v32, %v2428_v16  ;;  %v5257_v16 = vld [vmem:[#allocation2 + $0xb0] ss:$0 sps:$4 sm:$0x11]   ;;  %v5262_v40 = vsel %vm2426_vm10, %v2445_v59, %v2446_v53  ;;  %v2451_v49 = vrot.slane %v3432_v2, 1  ;;  %v3435_v32 = vcombine.low %v2020_v24, %v5197_v4  ;;  %v2023_v46 = vld [vmem:[#allocation2 + $0xa8] sm:$0xe] }
 0x1c1   :  { %2786 = vmatprep.mubr.bf16.mxu1 %v2277_v19  ;;  %v5267_v38 = vsel %vm2426_vm10, %v2448_v7, %v2449_v28  ;;  %v2454_v19 = vrot.slane %v3433_v45, 1  ;;  %v5271_v9 = vld [vmem:[#allocation2 + $0xbc] ss:$0 sps:$4 sm:$0x11]   ;;  %v2457_v1 = vrot.slane %v3434_v34, 1  ;;  %v2461_v13 = vrot.slane %v5230_v52, 1 }
 0x1c2   :  { %v5274_v12 = vsel %vm2426_vm10, %v2451_v49, %v2452_v29  ;;  %v3436_v55 = vcombine.low %v2021_v6, %v1986_v43  ;;  %v2460_v5 = vrot.slane %v3435_v32, 1  ;;  %v2464_v10 = vrot.slane %v5237_v35, 1  ;;  %v2024_v27 = vld [vmem:[#allocation2 + $0xb4] sm:$0xe]  ;;  %v1985_v48 = vld [vmem:[#allocation2 + $0x90] sm:$0xf] }
 0x1c3   :  { %v5278_v31 = vsel %vm2426_vm10, %v2454_v19, %v2455_v11  ;;  %v3437_v51 = vcombine.low %v2022_v63, %v1988_v25  ;;  %v3438_v23 = vcombine.low %v2023_v46, %v1990_v18  ;;  %v2470_v14 = vrot.slane %v5257_v16, 1  ;;  %v1987_v6 = vld [vmem:[#allocation2 + $0x9c] sm:$0xf]  ;;  %v1989_v19 = vld [vmem:[#allocation2 + $0xa8] sm:$0xf] }
 0x1c4   :  { %v2463_v4 = vrot.slane %v3436_v55, 1  ;;  %v5286_v20 = vsel %vm2426_vm10, %v2460_v5, %v2461_v13  ;;  %v3439_v57 = vcombine.low %v2024_v27, %v5259_v54  ;;  %v2300_v42 = vrot.slane %v2298_v21, 1  ;;  %v1991_v5 = vld [vmem:[#allocation2 + $0xb4] sm:$0xf] }
 0x1c5   :  { %v2466_v44 = vrot.slane %v3437_v51, 1  ;;  %v2469_v15 = vrot.slane %v3438_v23, 1  ;;  %v2473_v62 = vrot.slane %v5271_v9, 1  ;;  %v2307_v28 = vrot.slane %v2305_v60, 1 }
 0x1c6   :  { %v5293_v0 = vsel %vm2426_vm10, %v2463_v4, %v2464_v10  ;;  %v2472_v56 = vrot.slane %v3439_v57, 1  ;;  %v2301_v59 = vsel %vm2169_vm9, %v5215_v22, %v2300_v42  ;;  %v2303_v24 = vshrl.u32 %v5205_v30, 16 }
 0x1c7   :  { %v5305_v21 = vsel %vm2426_vm10, %v2469_v15, %v2470_v14  ;;  %v2310_v7 = vshll.u32 %v5230_v52, 16  ;;  %v2322_v11 = vshll.u32 %v5237_v35, 16  ;;  %v3406_v46 = vcombine.low %v1989_v19, %v1990_v18 }
 0x1c8   :  { %2787 = vmatmul.mubr.bf16.gmra.mrb[28].mxu1 %v5171_v47  ;;  %v2458_v47 = vrot.slane %v5199_v58, 1  ;;  %v3404_v58 = vcombine.low %v1985_v48, %v1986_v43  ;;  %v5308_v2 = vsel %vm2426_vm10, %v2472_v56, %v2473_v62  ;;  %v2308_v29 = vor.u32 %v2307_v28, %v2303_v24 }
 0x1c9   :  { %2794 = vmatprep.mubr.bf16.mxu1 %v2289_v3  ;;  %v2467_v3 = vrot.slane %v5244_v17, 1  ;;  %v2312_v45 = vrot.slane %v2310_v7, 1  ;;  %v3405_v43 = vcombine.low %v1987_v6, %v1988_v25  ;;  %v2341_v25 = vshll.u32 %v3406_v46, 16 }
 0x1ca   :  { %v5282_v8 = vsel %vm2426_vm10, %v2457_v1, %v2458_v47  ;;  %v2315_v49 = vshrl.u32 %v3404_v58, 16  ;;  %v2324_v47 = vrot.slane %v2322_v11, 1  ;;  %v2334_v1 = vshll.u32 %v5244_v17, 16 }
 0x1cb   :  { %v5297_v53 = vsel %vm2426_vm10, %v2466_v44, %v2467_v3  ;;  %v2313_v22 = vsel %vm2169_vm9, %v2308_v29, %v2312_v45  ;;  %v2329_v63 = vshll.u32 %v3405_v43, 16  ;;  %v2343_v10 = vrot.slane %v2341_v25, 1 }
 0x1cc   :  { %v2336_v55 = vrot.slane %v2334_v1, 1  ;;  %v3407_v51 = vcombine.low %v1991_v5, %v5259_v54  ;;  %v2346_v4 = vshll.u32 %v5257_v16, 16  ;;  %v2358_v44 = vshll.u32 %v5271_v9, 16 }
 0x1cd   :  { %v2331_v32 = vrot.slane %v2329_v63, 1  ;;  %vm3198_vm0 = vcmask 1046534  }
 0x1ce   :  { %v2353_v18 = vshll.u32 %v3407_v51, 16  ;;  %v2348_v23 = vrot.slane %v2346_v4, 1  ;;  %v2351_v48 = vshrl.u32 %v3407_v51, 16  ;;  %v2360_v57 = vrot.slane %v2358_v44, 1 }
 0x1d0   :  { %2795 = vmatmul.mubr.bf16.gmra.mrb[32].mxu1 %v5180_v41  ;;  %v2317_v41 = vshll.u32 %v3404_v58, 16  ;;  %v2355_v27 = vrot.slane %v2353_v18, 1 }
 0x1d1   :  { %2802 = vmatprep.mubr.bf16.mxu1 %v2301_v59 }
 0x1d2   :  { %v2319_v60 = vrot.slane %v2317_v41, 1  ;;  %v2356_v14 = vor.u32 %v2355_v27, %v2351_v48 }
 0x1d4   :  { %v2320_v34 = vor.u32 %v2319_v60, %v2315_v49  ;;  %v2361_v54 = vsel %vm2169_vm9, %v2356_v14, %v2360_v57 }
 0x1d6   :  { %v2325_v52 = vsel %vm2169_vm9, %v2320_v34, %v2324_v47 }
 0x1d8   :  { %2803 = vmatmul.mubr.bf16.gmra.mrb[36].mxu1 %v5186_v50  ;;  %v2327_v50 = vshrl.u32 %v3405_v43, 16 }
 0x1d9   :  { %2810 = vmatprep.mubr.bf16.mxu1 %v2313_v22 }
 0x1da   :  { %v2332_v13 = vor.u32 %v2331_v32, %v2327_v50 }
 0x1dc   :  { %v2337_v35 = vsel %vm2169_vm9, %v2332_v13, %v2336_v55 }
 0x1e0   :  { %2811 = vmatmul.mubr.bf16.gmra.mrb[40].mxu1 %v5205_v30  ;;  %v2339_v30 = vshrl.u32 %v3406_v46, 16 }
 0x1e1   :  { %2818 = vmatprep.mubr.bf16.mxu1 %v2325_v52 }
 0x1e2   :  { %v2344_v3 = vor.u32 %v2343_v10, %v2339_v30 }
 0x1e4   :  { %v2349_v17 = vsel %vm2169_vm9, %v2344_v3, %v2348_v23 }
 0x1e8   :  { %2819 = vmatmul.mubr.bf16.gmra.mrb[44].mxu1 %v3404_v58 }
 0x1e9   :  { %2826 = vmatprep.mubr.bf16.mxu1 %v2337_v35 }
 0x1f0   :  { %2827 = vmatmul.mubr.bf16.gmra.mrb[48].mxu1 %v3405_v43 }
 0x1f1   :  { %2834 = vmatprep.mubr.bf16.mxu1 %v2349_v17 }
 0x1f8   :  { %2835 = vmatmul.mubr.bf16.gmra.mrb[52].mxu1 %v3406_v46 }
 0x1f9   :  { %2842 = vmatprep.mubr.bf16.mxu1 %v2361_v54 }
 0x200   :  { %2843 = vmatmul.mubr.bf16.gmra.mrb[56].mxu1 %v3407_v51 }
 0x201   :  { %3865 = vmatprep.mubr.bf16.mxu1 %v5223_v37 }
 0x208   :  { %3866 = vmatmul.mubr.bf16.vlgmr.msra.gmra.mrb[60].mxu1 %v5219_v39 }
 0x209   :  { %3869 = vmatprep.mubr.bf16.mxu1 %v5233_v26 }
 0x210   :  { %3870 = vmatmul.mubr.bf16.gmra.mrb[64].mxu1 %v5240_v36 }
 0x211   :  { %3873 = vmatprep.mubr.bf16.mxu1 %v5247_v33 }
 0x218   :  { %3874 = vmatmul.mubr.bf16.gmra.mrb[68].mxu1 %v5252_v61 }
 0x219   :  { %3877 = vmatprep.mubr.bf16.mxu1 %v5262_v40 }
 0x220   :  { %3878 = vmatmul.mubr.bf16.gmra.mrb[72].mxu1 %v5267_v38 }
 0x221   :  { %3881 = vmatprep.mubr.bf16.mxu1 %v5274_v12 }
 0x228   :  { %3882 = vmatmul.mubr.bf16.gmra.mrb[76].mxu1 %v5278_v31 }
 0x229   :  { %3885 = vmatprep.mubr.bf16.mxu1 %v5282_v8 }
 0x230   :  { %3886 = vmatmul.mubr.bf16.gmra.mrb[80].mxu1 %v5286_v20 }
 0x231   :  { %3889 = vmatprep.mubr.bf16.mxu1 %v5293_v0 }
 0x238   :  { %3890 = vmatmul.mubr.bf16.gmra.mrb[84].mxu1 %v5297_v53 }
 0x239   :  { %3893 = vmatprep.mubr.bf16.mxu1 %v5305_v21 }
 0x240   :  { %3894 = vmatmul.mubr.bf16.gmra.mrb[88].mxu1 %v5308_v2 }
 0x25d   :  { %v3633_v39 = vpop.f32.mrb[0].mxu1 }
 0x25e   :  { %v3634_v37 = vpop.f32.mrb[1].mxu1 }
 0x25f   :  { %v5340_v26 = vadd.f32 %v3634_v37, %v3633_v39  ;;  %v3636_v36 = vpop.f32.mrb[2].mxu1 }
 0x260   :  { %v3637_v33 = vpop.f32.mrb[3].mxu1 }
 0x261   :  { %v5342_v61 = vadd.f32 %v3637_v33, %v3636_v36 }
 0x264   :  { %v3627_v16 = vpop.f32.mrb[32].mxu0 }
 0x265   :  { %v3628_v40 = vpop.f32.mrb[33].mxu0 }
 0x266   :  { %v5344_v38 = vadd.f32 %v3628_v40, %v3627_v16  ;;  %v3630_v9 = vpop.f32.mrb[34].mxu0 }
 0x267   :  { %v3631_v12 = vpop.f32.mrb[35].mxu0 }
 0x268   :  { %v5346_v31 = vadd.f32 %v3631_v12, %v3630_v9 }
 0x26b   :  { %v3639_v8 = vpop.f32.mrb[4].mxu1 }
 0x26c   :  { %v3640_v20 = vpop.f32.mrb[5].mxu1 }
 0x26d   :  { %v5348_v42 = vadd.f32 %v3640_v20, %v3639_v8  ;;  %v3642_v0 = vpop.f32.mrb[6].mxu1 }
 0x26e   :  { %v3643_v15 = vpop.f32.mrb[7].mxu1 }
 0x26f   :  { %v5350_v62 = vadd.f32 %v3643_v15, %v3642_v0 }
 0x273   :  { %v3645_v53 = vpop.f32.mrb[8].mxu1 }
 0x274   :  { %v3646_v56 = vpop.f32.mrb[9].mxu1 }
 0x275   :  { %v5352_v59 = vadd.f32 %v3646_v56, %v3645_v53  ;;  %v3648_v28 = vpop.f32.mrb[10].mxu1 }
 0x276   :  { %v3649_v58 = vpop.f32.mrb[11].mxu1 }
 0x277   :  { %v5354_v21 = vadd.f32 %v3649_v58, %v3648_v28 }
 0x27b   :  { %v3651_v2 = vpop.f32.mrb[12].mxu1 }
 0x27c   :  { %v3652_v24 = vpop.f32.mrb[13].mxu1 }
 0x27d   :  { %v5356_v7 = vadd.f32 %v3652_v24, %v3651_v2  ;;  %v3654_v29 = vpop.f32.mrb[14].mxu1 }
 0x27e   :  { %v3655_v41 = vpop.f32.mrb[15].mxu1 }
 0x27f   :  { %v5358_v45 = vadd.f32 %v3655_v41, %v3654_v29 }
 0x283   :  { %v3657_v6 = vpop.f32.mrb[16].mxu1 }
 0x284   :  { %v3658_v22 = vpop.f32.mrb[17].mxu1 }
 0x285   :  { %v5360_v60 = vadd.f32 %v3658_v22, %v3657_v6  ;;  %v3660_v43 = vpop.f32.mrb[18].mxu1 }
 0x286   :  { %v3661_v49 = vpop.f32.mrb[19].mxu1 }
 0x287   :  { %v5362_v11 = vadd.f32 %v3661_v49, %v3660_v43 }
 0x28b   :  { %v3663_v34 = vpop.f32.mrb[20].mxu1 }
 0x28c   :  { %v3664_v63 = vpop.f32.mrb[21].mxu1 }
 0x28d   :  { %v5364_v19 = vadd.f32 %v3664_v63, %v3663_v34  ;;  %v3666_v47 = vpop.f32.mrb[22].mxu1 }
 0x28e   :  { %v3667_v52 = vpop.f32.mrb[23].mxu1 }
 0x28f   :  { %v5366_v32 = vadd.f32 %v3667_v52, %v3666_v47 }
 0x293   :  { %v3669_v46 = vpop.f32.mrb[24].mxu1 }
 0x294   :  { %v3670_v50 = vpop.f32.mrb[25].mxu1 }
 0x295   :  { %v5368_v1 = vadd.f32 %v3670_v50, %v3669_v46  ;;  %v3672_v13 = vpop.f32.mrb[26].mxu1 }
 0x296   :  { %v3673_v25 = vpop.f32.mrb[27].mxu1 }
 0x297   :  { %v5370_v55 = vadd.f32 %v3673_v25, %v3672_v13 }
 0x29b   :  { %v3675_v5 = vpop.f32.mrb[28].mxu1 }
 0x29c   :  { %v3676_v35 = vpop.f32.mrb[29].mxu1 }
 0x29d   :  { %v5372_v10 = vadd.f32 %v3676_v35, %v3675_v5  ;;  %v3678_v51 = vpop.f32.mrb[30].mxu1  ;;  %v5407_v5 = vld [vmem:[%s5503_s4] ss:$0 sm:$0xff]  ;;  %s4097_s4 = smov [#allocation3]  }
 0x29e   :  { %v3679_v30 = vpop.f32.mrb[31].mxu1  ;;  %v2733_v35 = vadd.f32 %v5340_v26, %v5407_v5  ;;  %s3218_s27 = sshll.u32 %s4097_s4, 4  ;;  %s3219_s27 = int_to_ptr.vmem [resolvable:$true] %s3218_s27 }
 0x29f   :  { %v5374_v4 = vadd.f32 %v3679_v30, %v3678_v51  ;;  %v2725_v30 = vadd.f32 %v5344_v38, %v5407_v5  ;;  %v2749_v38 = vadd.f32 %v5352_v59, %v5407_v5  ;;  %s4072_s28 = scalar_lea.vmem %s3219_s27, 256  ;;  %p4077_p1 = scmp.lt.s32.totalorder %s3219_s27, %s3219_s27 }
 0x2a0   :  { %p4073_p0 = scmp.ne.s32.totalorder %s3219_s27, %s4072_s28  ;;  %p4078_p2 = scmp.lt.s32.totalorder %s4072_s28, %s4072_s28 }
 0x2a2   :  { %p4079_p3 = por %p4078_p2, %p4077_p1 }
 0x2a3   :  { %v3681_v3 = vpop.f32.mrb[32].mxu1 }
 0x2a4   :  { %v3682_v18 = vpop.f32.mrb[33].mxu1  ;;  %p4080_p4 = pnand %p4079_p3, %p4073_p0 }
 0x2a5   :  { %v5376_v23 = vadd.f32 %v3682_v18, %v3681_v3  ;;  %v3684_v17 = vpop.f32.mrb[34].mxu1 }
 0x2a6   :  { %v3685_v27 = vpop.f32.mrb[35].mxu1 }
 0x2a7   :  { %v5378_v48 = vadd.f32 %v3685_v27, %v3684_v17  ;;  %v2736_v17 = vadd.f32 %v5342_v61, %v5407_v5  ;;  %v2741_v61 = vadd.f32 %v5348_v42, %v5407_v5 }
 0x2ab   :  { %v3687_v44 = vpop.f32.mrb[36].mxu1 }
 0x2ac   :  { %v3688_v14 = vpop.f32.mrb[37].mxu1 }
 0x2ad   :  { %v5380_v57 = vadd.f32 %v3688_v14, %v3687_v44  ;;  %v3690_v54 = vpop.f32.mrb[38].mxu1  ;;  %v2728_v14 = vadd.f32 %v5346_v31, %v5407_v5  ;;  %v2752_v31 = vadd.f32 %v5354_v21, %v5407_v5  ;;  %v2765_v21 = vadd.f32 %v5360_v60, %v5407_v5 }
 0x2ae   :  { %v3691_v39 = vpop.f32.mrb[39].mxu1  ;;  %v2760_v60 = vadd.f32 %v5358_v45, %v5407_v5  ;;  %v2781_v45 = vadd.f32 %v5368_v1, %v5407_v5  ;;  %v2776_v1 = vadd.f32 %v5366_v32, %v5407_v5 }
 0x2af   :  { %v5382_v37 = vadd.f32 %v3691_v39, %v3690_v54 }
 0x2b3   :  { %v3693_v36 = vpop.f32.mrb[40].mxu1 }
 0x2b4   :  { %v3694_v33 = vpop.f32.mrb[41].mxu1 }
 0x2b5   :  { %v5384_v16 = vadd.f32 %v3694_v33, %v3693_v36  ;;  %v3696_v40 = vpop.f32.mrb[42].mxu1 }
 0x2b6   :  { %v3697_v9 = vpop.f32.mrb[43].mxu1 }
 0x2b7   :  { %v5386_v12 = vadd.f32 %v3697_v9, %v3696_v40 }
 0x2bb   :  { %v3699_v8 = vpop.f32.mrb[44].mxu1 }
 0x2bc   :  { %v3700_v20 = vpop.f32.mrb[45].mxu1 }
 0x2bd   :  { %v5388_v0 = vadd.f32 %v3700_v20, %v3699_v8  ;;  %v3702_v15 = vpop.f32.mrb[46].mxu1 }
 0x2be   :  { %v3703_v53 = vpop.f32.mrb[47].mxu1 }
 0x2bf   :  { %v5390_v56 = vadd.f32 %v3703_v53, %v3702_v15 }
 0x2c3   :  { %v3705_v28 = vpop.f32.mrb[48].mxu1 }
 0x2c4   :  { %v3706_v58 = vpop.f32.mrb[49].mxu1 }
 0x2c5   :  { %v5392_v2 = vadd.f32 %v3706_v58, %v3705_v28  ;;  %v3708_v24 = vpop.f32.mrb[50].mxu1 }
 0x2c6   :  { %v3709_v29 = vpop.f32.mrb[51].mxu1 }
 0x2c7   :  { %v5394_v41 = vadd.f32 %v3709_v29, %v3708_v24 }
 0x2cb   :  { %v3711_v6 = vpop.f32.mrb[52].mxu1 }
 0x2cc   :  { %v3712_v22 = vpop.f32.mrb[53].mxu1 }
 0x2cd   :  { %v5396_v43 = vadd.f32 %v3712_v22, %v3711_v6  ;;  %v3714_v49 = vpop.f32.mrb[54].mxu1  ;;  %v2744_v22 = vadd.f32 %v5350_v62, %v5407_v5  ;;  %v2757_v62 = vadd.f32 %v5356_v7, %v5407_v5 }
 0x2ce   :  { %v3715_v34 = vpop.f32.mrb[55].mxu1 }
 0x2cf   :  { %v5398_v63 = vadd.f32 %v3715_v34, %v3714_v49 }
 0x2d3   :  { %v3717_v47 = vpop.f32.mrb[56].mxu1 }
 0x2d4   :  { %v3718_v52 = vpop.f32.mrb[57].mxu1 }
 0x2d5   :  { %v5400_v46 = vadd.f32 %v3718_v52, %v3717_v47  ;;  %v3720_v50 = vpop.f32.mrb[58].mxu1 }
 0x2d6   :  { %v3721_v13 = vpop.f32.mrb[59].mxu1 }
 0x2d7   :  { %v5402_v25 = vadd.f32 %v3721_v13, %v3720_v50 }
 0x2db   :  { %v3867_v51 = vpop.f32.mrb[60].mxu1 }
 0x2dc   :  { %v2894_v3 = vadd.f32 %v3867_v51, %v2733_v35  ;;  %v2885_v18 = vpop.f32.mrb[61].mxu1 }
 0x2dd   :  { %v2886_v27 = vadd.f32 %v2885_v18, %v2725_v30  ;;  %v3868_v44 = vpop.f32.mrb[62].mxu1 }
 0x2de   :  { %v2897_v54 = vadd.f32 %v3868_v44, %v2736_v17  ;;  %v2888_v39 = vpop.f32.mrb[63].mxu1  ;;  %v3014_v33 = vmax.f32 %v2894_v3, 0.0 }
 0x2df   :  { %v2889_v36 = vadd.f32 %v2888_v39, %v2728_v14  ;;  %v3012_v26 = vmax.f32 %v2886_v27, 0.0 }
 0x2e0   :  { %v3015_v40 = vmax.f32 %v2897_v54, 0.0 }
 0x2e1   :  { %v3013_v9 = vmax.f32 %v2889_v36, 0.0 }
 0x2e2   :  { %v3051_v8 = vadd.f32 %v3015_v40, %v3014_v33  ;;  %v2768_v33 = vadd.f32 %v5362_v11, %v5407_v5 }
 0x2e3   :  { %v3044_v20 = vadd.f32 %v3013_v9, %v3012_v26  ;;  %v3871_v15 = vpop.f32.mrb[64].mxu1 }
 0x2e4   :  { %v3052_v53 = vrot.slane %v3051_v8, 4  ;;  %v2910_v28 = vadd.f32 %v3871_v15, %v2749_v38  ;;  %v2901_v58 = vpop.f32.mrb[65].mxu1 }
 0x2e5   :  { %v3045_v24 = vrot.slane %v3044_v20, 4  ;;  %v2902_v29 = vadd.f32 %v2901_v58, %v2741_v61  ;;  %v3872_v6 = vpop.f32.mrb[66].mxu1 }
 0x2e6   :  { %v3053_v49 = vadd.f32 %v3052_v53, %v3051_v8  ;;  %v2913_v34 = vadd.f32 %v3872_v6, %v2752_v31  ;;  %v2904_v59 = vpop.f32.mrb[67].mxu1  ;;  %v3018_v13 = vmax.f32 %v2910_v28, 0.0 }
 0x2e7   :  { %v3046_v47 = vadd.f32 %v3045_v24, %v3044_v20  ;;  %v2905_v52 = vadd.f32 %v2904_v59, %v2744_v22  ;;  %v3016_v51 = vmax.f32 %v2902_v29, 0.0 }
 0x2e8   :  { %v3054_v50 = vrot.slane %v3053_v49, 2  ;;  %v3019_v42 = vmax.f32 %v2913_v34, 0.0 }
 0x2e9   :  { %v3047_v35 = vrot.slane %v3046_v47, 2  ;;  %v3017_v30 = vmax.f32 %v2905_v52, 0.0 }
 0x2ea   :  { %v3055_v3 = vadd.f32 %v3054_v50, %v3053_v49  ;;  %v3065_v18 = vadd.f32 %v3019_v42, %v3018_v13  ;;  %v2773_v42 = vadd.f32 %v5364_v19, %v5407_v5 }
 0x2eb   :  { %v3048_v17 = vadd.f32 %v3047_v35, %v3046_v47  ;;  %v3058_v27 = vadd.f32 %v3017_v30, %v3016_v51  ;;  %v3875_v44 = vpop.f32.mrb[68].mxu1 }
 0x2ec   :  { %v3056_v14 = vrot.slane %v3055_v3, 1  ;;  %v3066_v54 = vrot.slane %v3065_v18, 4  ;;  %v2926_v39 = vadd.f32 %v3875_v44, %v2765_v21  ;;  %v2917_v36 = vpop.f32.mrb[69].mxu1 }
 0x2ed   :  { %v3049_v40 = vrot.slane %v3048_v17, 1  ;;  %v3059_v26 = vrot.slane %v3058_v27, 4  ;;  %v2918_v9 = vadd.f32 %v2917_v36, %v2757_v62  ;;  %v3876_v8 = vpop.f32.mrb[70].mxu1 }
 0x2ee   :  { %v3057_v38 = vadd.f32 %v3056_v14, %v3055_v3  ;;  %v3067_v20 = vadd.f32 %v3066_v54, %v3065_v18  ;;  %v2929_v15 = vadd.f32 %v3876_v8, %v2768_v33  ;;  %v2920_v61 = vpop.f32.mrb[71].mxu1  ;;  %v3022_v24 = vmax.f32 %v2926_v39, 0.0 }
 0x2ef   :  { %v3050_v53 = vadd.f32 %v3049_v40, %v3048_v17  ;;  %v3060_v7 = vadd.f32 %v3059_v26, %v3058_v27  ;;  %v2921_v28 = vadd.f32 %v2920_v61, %v2760_v60  ;;  %v3020_v22 = vmax.f32 %v2918_v9, 0.0 }
 0x2f0   :  { %v3157_v58 = vmul.f32 0.0625, %v3057_v38  ;;  %v3068_v31 = vrot.slane %v3067_v20, 2  ;;  %v3023_v29 = vmax.f32 %v2929_v15, 0.0  ;;  %v2784_v18 = vadd.f32 %v5370_v55, %v5407_v5 }
 0x2f1   :  { %v3156_v11 = vmul.f32 0.0625, %v3050_v53  ;;  %v3061_v6 = vrot.slane %v3060_v7, 2  ;;  %v3021_v49 = vmax.f32 %v2921_v28, 0.0  ;;  %v2789_v55 = vadd.f32 %v5372_v10, %v5407_v5 }
 0x2f2   :  { %v3069_v34 = vadd.f32 %v3068_v31, %v3067_v20  ;;  %v3079_v59 = vadd.f32 %v3023_v29, %v3022_v24  ;;  %v2797_v53 = vadd.f32 %v5376_v23, %v5407_v5  ;;  %v2800_v24 = vadd.f32 %v5378_v48, %v5407_v5 }
 0x2f3   :  { %v3189_v47 = vsel %vm3188_vm11, %v3157_v58, %v3156_v11  ;;  %v3062_v52 = vadd.f32 %v3061_v6, %v3060_v7  ;;  %v3072_v50 = vadd.f32 %v3021_v49, %v3020_v22  ;;  %v3879_v13 = vpop.f32.mrb[72].mxu1  ;;  %v2792_v23 = vadd.f32 %v5374_v4, %v5407_v5 }
 0x2f4   :  { %v3070_v35 = vrot.slane %v3069_v34, 1  ;;  %v3080_v51 = vrot.slane %v3079_v59, 4  ;;  %v2942_v30 = vadd.f32 %v3879_v13, %v2781_v45  ;;  %v2933_v3 = vpop.f32.mrb[73].mxu1 }
 0x2f5   :  { %v3063_v21 = vrot.slane %v3062_v52, 1  ;;  %v3073_v17 = vrot.slane %v3072_v50, 4  ;;  %v2934_v27 = vadd.f32 %v2933_v3, %v2773_v42  ;;  %v3880_v44 = vpop.f32.mrb[74].mxu1 }
 0x2f6   :  { %v3071_v62 = vadd.f32 %v3070_v35, %v3069_v34  ;;  %v3081_v14 = vadd.f32 %v3080_v51, %v3079_v59  ;;  %v2945_v54 = vadd.f32 %v3880_v44, %v2784_v18  ;;  %v2936_v39 = vpop.f32.mrb[75].mxu1  ;;  %v3026_v26 = vmax.f32 %v2942_v30, 0.0 }
 0x2f7   :  { %v3064_v19 = vadd.f32 %v3063_v21, %v3062_v52  ;;  %v3074_v36 = vadd.f32 %v3073_v17, %v3072_v50  ;;  %v2937_v33 = vadd.f32 %v2936_v39, %v2776_v1  ;;  %v3024_v38 = vmax.f32 %v2934_v27, 0.0 }
 0x2f8   :  { %v3082_v40 = vrot.slane %v3081_v14, 2  ;;  %v3027_v9 = vmax.f32 %v2945_v54, 0.0  ;;  %v3159_v32 = vmul.f32 0.0625, %v3071_v62  ;;  %v2805_v18 = vadd.f32 %v5380_v57, %v5407_v5 }
 0x2f9   :  { %v3158_v8 = vmul.f32 0.0625, %v3064_v19  ;;  %v3075_v60 = vrot.slane %v3074_v36, 2  ;;  %v3025_v20 = vmax.f32 %v2937_v33, 0.0  ;;  %v2816_v33 = vadd.f32 %v5386_v12, %v5407_v5 }
 0x2fa   :  { %v3083_v15 = vadd.f32 %v3082_v40, %v3081_v14  ;;  %v3093_v61 = vadd.f32 %v3027_v9, %v3026_v26  ;;  %v2813_v14 = vadd.f32 %v5384_v16, %v5407_v5  ;;  %v2808_v16 = vadd.f32 %v5382_v37, %v5407_v5 }
 0x2fb   :  { %v3191_v7 = vsel %vm3190_vm12, %v3158_v8, %v3189_v47  ;;  %v3076_v28 = vadd.f32 %v3075_v60, %v3074_v36  ;;  %v3086_v58 = vadd.f32 %v3025_v20, %v3024_v38  ;;  %v3883_v31 = vpop.f32.mrb[76].mxu1 }
 0x2fc   :  { %v3084_v29 = vrot.slane %v3083_v15, 1  ;;  %v3193_v10 = vsel %vm3192_vm13, %v3159_v32, %v3191_v7  ;;  %v3094_v11 = vrot.slane %v3093_v61, 4  ;;  %v2958_v6 = vadd.f32 %v3883_v31, %v2797_v53  ;;  %v2949_v22 = vpop.f32.mrb[77].mxu1 }
 0x2fd   :  { %v3077_v49 = vrot.slane %v3076_v28, 1  ;;  %v3087_v34 = vrot.slane %v3086_v58, 4  ;;  %v2950_v59 = vadd.f32 %v2949_v22, %v2789_v55  ;;  %v3884_v45 = vpop.f32.mrb[78].mxu1 }
 0x2fe   :  { %v3085_v47 = vadd.f32 %v3084_v29, %v3083_v15  ;;  %v3095_v52 = vadd.f32 %v3094_v11, %v3093_v61  ;;  %v2961_v50 = vadd.f32 %v3884_v45, %v2800_v24  ;;  %v2952_v13 = vpop.f32.mrb[79].mxu1  ;;  %v3030_v30 = vmax.f32 %v2958_v6, 0.0 }
 0x2ff   :  { %v3078_v42 = vadd.f32 %v3077_v49, %v3076_v28  ;;  %v3088_v48 = vadd.f32 %v3087_v34, %v3086_v58  ;;  %v2953_v35 = vadd.f32 %v2952_v13, %v2792_v23  ;;  %v3028_v27 = vmax.f32 %v2950_v59, 0.0 }
 0x300   :  { %v3096_v51 = vrot.slane %v3095_v52, 2  ;;  %v3031_v3 = vmax.f32 %v2961_v50, 0.0  ;;  %v3161_v4 = vmul.f32 0.0625, %v3085_v47  ;;  %v2821_v29 = vadd.f32 %v5388_v0, %v5407_v5 }
 0x301   :  { %v3160_v21 = vmul.f32 0.0625, %v3078_v42  ;;  %v3089_v17 = vrot.slane %v3088_v48, 2  ;;  %v3029_v44 = vmax.f32 %v2953_v35, 0.0  ;;  %v2829_v59 = vadd.f32 %v5392_v2, %v5407_v5 }
 0x302   :  { %v3097_v1 = vadd.f32 %v3096_v51, %v3095_v52  ;;  %v3107_v62 = vadd.f32 %v3031_v3, %v3030_v30  ;;  %v2832_v52 = vadd.f32 %v5394_v41, %v5407_v5  ;;  %v2824_v2 = vadd.f32 %v5390_v56, %v5407_v5 }
 0x303   :  { %v3195_v54 = vsel %vm3194_vm14, %v3160_v21, %v3193_v10  ;;  %v3090_v39 = vadd.f32 %v3089_v17, %v3088_v48  ;;  %v3100_v19 = vadd.f32 %v3029_v44, %v3028_v27  ;;  %v3887_v36 = vpop.f32.mrb[80].mxu1  ;;  %v2845_v56 = vadd.f32 %v5400_v46, %v5407_v5 }
 0x304   :  { %v3098_v40 = vrot.slane %v3097_v1, 1  ;;  %v3108_v57 = vrot.slane %v3107_v62, 4  ;;  %v2974_v26 = vadd.f32 %v3887_v36, %v2813_v14  ;;  %v2965_v9 = vpop.f32.mrb[81].mxu1  ;;  %v3197_v55 = vsel %vm3196_vm15, %v3161_v4, %v3195_v54 }
 0x305   :  { %v3091_v8 = vrot.slane %v3090_v39, 1  ;;  %v3101_v60 = vrot.slane %v3100_v19, 4  ;;  %v2966_v38 = vadd.f32 %v2965_v9, %v2805_v18  ;;  %v3888_v20 = vpop.f32.mrb[82].mxu1  ;;  %v2840_v46 = vadd.f32 %v5398_v63, %v5407_v5 }
 0x306   :  { %v3099_v32 = vadd.f32 %v3098_v40, %v3097_v1  ;;  %v3109_v15 = vadd.f32 %v3108_v57, %v3107_v62  ;;  %v2977_v61 = vadd.f32 %v3888_v20, %v2816_v33  ;;  %v2968_v53 = vpop.f32.mrb[83].mxu1  ;;  %v3034_v31 = vmax.f32 %v2974_v26, 0.0 }
 0x307   :  { %v3092_v7 = vadd.f32 %v3091_v8, %v3090_v39  ;;  %v3102_v12 = vadd.f32 %v3101_v60, %v3100_v19  ;;  %v2969_v28 = vadd.f32 %v2968_v53, %v2808_v16  ;;  %v3032_v6 = vmax.f32 %v2966_v38, 0.0 }
 0x308   :  { %v3110_v58 = vrot.slane %v3109_v15, 2  ;;  %v3035_v24 = vmax.f32 %v2977_v61, 0.0  ;;  %v3163_v37 = vmul.f32 0.0625, %v3099_v32  ;;  %v2837_v38 = vadd.f32 %v5396_v43, %v5407_v5 }
 0x309   :  { %v3162_v10 = vmul.f32 0.0625, %v3092_v7  ;;  %v3103_v11 = vrot.slane %v3102_v12, 2  ;;  %v3033_v22 = vmax.f32 %v2969_v28, 0.0  ;;  %v2848_v61 = vadd.f32 %v5402_v25, %v5407_v5 }
 0x30a   :  { %v3111_v49 = vadd.f32 %v3110_v58, %v3109_v15  ;;  %v3121_v34 = vadd.f32 %v3035_v24, %v3034_v31 }
 0x30b   :  { %v3104_v45 = vadd.f32 %v3103_v11, %v3102_v12  ;;  %v3114_v23 = vadd.f32 %v3033_v22, %v3032_v6  ;;  %v3891_v47 = vpop.f32.mrb[84].mxu1  ;;  %v3199_v50 = vsel %vm3198_vm0, %v3162_v10, %v3197_v55 }
 0x30c   :  { %v3112_v13 = vrot.slane %v3111_v49, 1  ;;  %v3122_v0 = vrot.slane %v3121_v34, 4  ;;  %v2990_v42 = vadd.f32 %v3891_v47, %v2829_v59  ;;  %v2981_v48 = vpop.f32.mrb[85].mxu1  ;;  %v3201_v35 = vsel %vm3200_vm1, %v3163_v37, %v3199_v50 }
 0x30d   :  { %v3105_v51 = vrot.slane %v3104_v45, 1  ;;  %v3115_v30 = vrot.slane %v3114_v23, 4  ;;  %v2982_v3 = vadd.f32 %v2981_v48, %v2821_v29  ;;  %v3892_v18 = vpop.f32.mrb[86].mxu1  ;;  %3211 = vst [vmem:[#allocation3] sm:$0xff] %v3201_v35 }
 0x30e   :  { %v3113_v21 = vadd.f32 %v3112_v13, %v3111_v49  ;;  %v3123_v17 = vadd.f32 %v3122_v0, %v3121_v34  ;;  %v2993_v27 = vadd.f32 %v3892_v18, %v2832_v52  ;;  %v2984_v41 = vpop.f32.mrb[87].mxu1  ;;  %v3038_v54 = vmax.f32 %v2990_v42, 0.0 }
 0x30f   :  { %v3106_v44 = vadd.f32 %v3105_v51, %v3104_v45  ;;  %v3116_v4 = vadd.f32 %v3115_v30, %v3114_v23  ;;  %v2985_v1 = vadd.f32 %v2984_v41, %v2824_v2  ;;  %v3036_v33 = vmax.f32 %v2982_v3, 0.0 }
 0x310   :  { %v3165_v62 = vmul.f32 0.0625, %v3113_v21  ;;  %v3124_v14 = vrot.slane %v3123_v17, 2  ;;  %v3039_v39 = vmax.f32 %v2993_v27, 0.0 }
 0x311   :  { %v3164_v19 = vmul.f32 0.0625, %v3106_v44  ;;  %v3117_v36 = vrot.slane %v3116_v4, 2  ;;  %v3037_v40 = vmax.f32 %v2985_v1, 0.0 }
 0x312   :  { %v3125_v57 = vadd.f32 %v3124_v14, %v3123_v17  ;;  %v3135_v26 = vadd.f32 %v3039_v39, %v3038_v54 }
 0x313   :  { %v3202_v9 = vsel %vm3188_vm11, %v3165_v62, %v3164_v19  ;;  %v3118_v55 = vadd.f32 %v3117_v36, %v3116_v4  ;;  %v3128_v8 = vadd.f32 %v3037_v40, %v3036_v33  ;;  %v3895_v60 = vpop.f32.mrb[88].mxu1 }
 0x314   :  { %v3126_v20 = vrot.slane %v3125_v57, 1  ;;  %v3136_v16 = vrot.slane %v3135_v26, 4  ;;  %v3006_v32 = vadd.f32 %v3895_v60, %v2845_v56  ;;  %v2997_v15 = vpop.f32.mrb[89].mxu1 }
 0x315   :  { %v3119_v53 = vrot.slane %v3118_v55, 1  ;;  %v3129_v7 = vrot.slane %v3128_v8, 4  ;;  %v2998_v12 = vadd.f32 %v2997_v15, %v2837_v38  ;;  %v3896_v28 = vpop.f32.mrb[90].mxu1 }
 0x316   :  { %v3127_v58 = vadd.f32 %v3126_v20, %v3125_v57  ;;  %v3137_v31 = vadd.f32 %v3136_v16, %v3135_v26  ;;  %v3009_v24 = vadd.f32 %v3896_v28, %v2848_v61  ;;  %v3000_v29 = vpop.f32.mrb[91].mxu1  ;;  %v3042_v22 = vmax.f32 %v3006_v32, 0.0 }
 0x317   :  { %v3120_v10 = vadd.f32 %v3119_v53, %v3118_v55  ;;  %v3130_v43 = vadd.f32 %v3129_v7, %v3128_v8  ;;  %v3001_v11 = vadd.f32 %v3000_v29, %v2840_v46  ;;  %v3040_v25 = vmax.f32 %v2998_v12, 0.0 }
 0x318   :  { %v3138_v6 = vrot.slane %v3137_v31, 2  ;;  %v3043_v37 = vmax.f32 %v3009_v24, 0.0  ;;  %v3167_v45 = vmul.f32 0.0625, %v3127_v58 }
 0x319   :  { %v3166_v49 = vmul.f32 0.0625, %v3120_v10  ;;  %v3131_v34 = vrot.slane %v3130_v43, 2  ;;  %v3041_v59 = vmax.f32 %v3001_v11, 0.0 }
 0x31a   :  { %v3139_v23 = vadd.f32 %v3138_v6, %v3137_v31  ;;  %v3149_v47 = vadd.f32 %v3043_v37, %v3042_v22 }
 0x31b   :  { %v3203_v52 = vsel %vm3190_vm12, %v3166_v49, %v3202_v9  ;;  %v3132_v63 = vadd.f32 %v3131_v34, %v3130_v43  ;;  %v3142_v5 = vadd.f32 %v3041_v59, %v3040_v25 }
 0x31c   :  { %v3140_v50 = vrot.slane %v3139_v23, 1  ;;  %v3204_v13 = vsel %vm3192_vm13, %v3167_v45, %v3203_v52  ;;  %v3150_v0 = vrot.slane %v3149_v47, 4 }
 0x31d   :  { %v3133_v42 = vrot.slane %v3132_v63, 1  ;;  %v3143_v48 = vrot.slane %v3142_v5, 4 }
 0x31e   :  { %v3141_v35 = vadd.f32 %v3140_v50, %v3139_v23  ;;  %v3151_v51 = vadd.f32 %v3150_v0, %v3149_v47 }
 0x31f   :  { %v3134_v30 = vadd.f32 %v3133_v42, %v3132_v63  ;;  %v3144_v3 = vadd.f32 %v3143_v48, %v3142_v5 }
 0x320   :  { %v3152_v18 = vrot.slane %v3151_v51, 2  ;;  %v3169_v17 = vmul.f32 0.0625, %v3141_v35 }
 0x321   :  { %v3168_v2 = vmul.f32 0.0625, %v3134_v30  ;;  %v3145_v21 = vrot.slane %v3144_v3, 2 }
 0x322   :  { %v3153_v27 = vadd.f32 %v3152_v18, %v3151_v51 }
 0x323   :  { %v3205_v41 = vsel %vm3194_vm14, %v3168_v2, %v3204_v13  ;;  %v3146_v44 = vadd.f32 %v3145_v21, %v3144_v3 }
 0x324   :  { %v3154_v4 = vrot.slane %v3153_v27, 1  ;;  %v3206_v1 = vsel %vm3196_vm15, %v3169_v17, %v3205_v41 }
 0x325   :  { %v3147_v62 = vrot.slane %v3146_v44, 1 }
 0x326   :  { %v3155_v14 = vadd.f32 %v3154_v4, %v3153_v27 }
 0x327   :  { %v3148_v54 = vadd.f32 %v3147_v62, %v3146_v44 }
 0x328   :  { %v3171_v19 = vmul.f32 0.0625, %v3155_v14 }
 0x329   :  { %v3170_v39 = vmul.f32 0.0625, %v3148_v54 }
 0x32b   :  { %v3207_v36 = vsel %vm3198_vm0, %v3170_v39, %v3206_v1 }
 0x32c   :  { %v3208_v33 = vsel %vm3200_vm1, %v3171_v19, %v3207_v36 }
 0x32d   :  { %3212 = vst [vmem:[#allocation3 + $0x8] sm:$0xff] %v3208_v33 }
 0x32e   :  { %4083 = shalt.err (!%p4080_p4)
}
 0x32f   :  { %s4084_s6 = scalar_lea.hbm %s5504_s5, 256 }
 0x330   :  { %p4085_p5 = scmp.ne.s32.totalorder %s5504_s5, %s4084_s6  ;;  %p4088_p6 = scmp.lt.u32.totalorder %s4084_s6, %s5504_s5 }
 0x332   :  { %p4090_p7 = pnand %p4088_p6, %p4085_p5 }
 0x334   :  { %4093 = shalt.err (!%p4090_p7)
}
 0x335   :  { %s4098_s10 = smov 128   ;;  %s4099_s11 = smov 8  }
 0x336   :  { %3224 = dma.vmem_to_hbm [thread:$0]  %s3219_s27, 256, %s5504_s5, [#allocation4], %s4098_s10, %s4098_s10, %s4099_s11  }
 0x337   :  { %4094 = dma.done.wait [#allocation4], 256  }
 0x338   :  { %4095 = vsyncadd [#allocation4], 4294967040 }
 0x339   :  { %3228 = vsyncpa [#allocation4], 1 }

</bundles_post_ra>
